<compile_context>
chip_gen: v7x
topology: tpu7x:2x2x1
jax: 0.10.0
libtpu: 0.0.40
codegen_flags: <defaults>
</compile_context>

<pallas_src>
import jax
import jax.numpy as jnp
from jax.experimental import pallas as pl
from jax.experimental.pallas import tpu as pltpu


def _round_up(x, m):
    return ((x + m - 1) // m) * m


def _num_tensorcores():
    """Best-effort TensorCore count; defaults to 1 (the safe choice: never
    serialize the recurrence by splitting the batch on a single-TC chip)."""
    try:
        info = pltpu.get_tpu_info()
        for attr in ("num_cores", "core_count", "num_tensorcores",
                     "tensorcore_count", "cores_per_chip"):
            v = getattr(info, attr, None)
            if isinstance(v, int) and v > 0:
                return v
    except Exception:
        pass
    return 1


def _pick_vmem_limit(need_bytes):
    """Rightsize the scoped-VMEM limit: generous headroom over the actual need,
    but never more than ~75% of physical VMEM (v7x has only 64 MiB/TC)."""
    try:
        cap = int(pltpu.get_tpu_info().vmem_capacity_bytes)
    except Exception:
        cap = 128 * 1024 * 1024
    limit = max(2 * need_bytes + (4 << 20), 32 << 20)
    return int(min(limit, (cap * 3) // 4))


def _make_lstm_kernel(TC, BB, Hp, T_real, NT, return_sequence):
    """Kernel factory for fixed (time_chunk, batch_block, padded hidden) sizes."""
    H3 = 3 * Hp

    def kernel(x_ref, wih_ref, whh_ref, b_ref, wd_ref, bd_ref, *refs):
        if return_sequence:
            seq_ref, logits_ref, h_ref, c_ref = refs
        else:
            logits_ref, h_ref, c_ref = refs

        tc = pl.program_id(1)  # time-chunk index (innermost, sequential)

        @pl.when(tc == 0)
        def _init():
            h_ref[...] = jnp.zeros_like(h_ref)
            c_ref[...] = jnp.zeros_like(c_ref)
            # (no logits init: logits is fully overwritten in the last chunk)

        # Hoisted input projection for the whole chunk: one MXU-shaped matmul
        # (TC*BB, Ep) @ (Ep, 4Hp).  Only h @ W_hh remains in the recurrence.
        x2 = x_ref[...].reshape(TC * BB, x_ref.shape[-1])
        gates_in = (jnp.dot(x2, wih_ref[...], preferred_element_type=jnp.float32)
                    + b_ref[...])                               # (TC*BB, 4Hp) f32

        # Loop-local carries: one scratch load / one store per chunk, keeping the
        # store->load round trip off the latency-bound per-step critical path.
        h = h_ref[...]                                          # (BB, Hp) f32
        c = c_ref[...]
        # NOTE: an MXU weight-resident variant (matmul_push_rhs/acc_lhs/pop) could
        # keep W_hh staged across the TC steps; omitted for portability.
        for t in range(TC):
            gates = gates_in[t * BB:(t + 1) * BB] + jnp.dot(
                h.astype(jnp.bfloat16), whh_ref[...],
                preferred_element_type=jnp.float32)             # (BB, 4Hp) f32
            # Gate order (i, f, o, g): one contiguous sigmoid for the EUP, then tanh.
            sig = jax.nn.sigmoid(gates[:, :H3])
            i_g = sig[:, 0 * Hp:1 * Hp]
            f_g = sig[:, 1 * Hp:2 * Hp]
            o_g = sig[:, 2 * Hp:3 * Hp]
            g_g = jnp.tanh(gates[:, H3:])
            c_new = f_g * c + i_g * g_g
            h_new = o_g * jnp.tanh(c_new)
            if (NT - 1) * TC + t >= T_real:
                # This unrolled step can be a padded timestep (last chunk only):
                # freeze the carries so the final state equals step T_real-1.
                valid = (tc * TC + t) < T_real
                h_new = jnp.where(valid, h_new, h)
                c_new = jnp.where(valid, c_new, c)
            h, c = h_new, c_new
            if return_sequence:
                seq_ref[t] = h.astype(seq_ref.dtype)            # lane-dense bf16 store
        h_ref[...] = h
        c_ref[...] = c

        @pl.when(tc == NT - 1)
        def _decode():
            logits_ref[...] = (
                jnp.dot(h.astype(jnp.bfloat16), wd_ref[...],
                        preferred_element_type=jnp.float32)
                + bd_ref[...])

    return kernel


def _reorder_pad_gates(w, H, Hp):
    """PyTorch stacks LSTM gate params as (i, f, g, o) along dim 0 (size 4H).
    Reorder to (i, f, o, g) so the sigmoid gates are contiguous, and zero-pad each
    gate block from H to Hp rows."""
    i, f, g, o = jnp.split(w, 4, axis=0)
    pad = [(0, Hp - H)] + [(0, 0)] * (w.ndim - 1)
    return jnp.concatenate([jnp.pad(blk, pad) for blk in (i, f, o, g)], axis=0)


def _prepare_weights(params, E, H, L, Ep, Hp, Lp):
    """PyTorch-layout f32 params -> padded, gate-reordered, bf16 kernel operands."""
    w_ih = jnp.pad(params["w_ih"], ((0, 0), (0, Ep - E)))               # (4H, Ep)
    w_ih = _reorder_pad_gates(w_ih, H, Hp).T.astype(jnp.bfloat16)       # (Ep, 4Hp)

    w_hh = jnp.pad(params["w_hh"], ((0, 0), (0, Hp - H)))               # (4H, Hp)
    w_hh = _reorder_pad_gates(w_hh, H, Hp).T.astype(jnp.bfloat16)       # (Hp, 4Hp)

    b = _reorder_pad_gates(params["b_ih"] + params["b_hh"], H, Hp)      # (4Hp,)
    b = b.reshape(1, 4 * Hp).astype(jnp.float32)

    w_dec = jnp.pad(params["w_dec"], ((0, Lp - L), (0, Hp - H)))        # (Lp, Hp)
    w_dec = w_dec.T.astype(jnp.bfloat16)                                # (Hp, Lp)
    b_dec = jnp.pad(params["b_dec"], (0, Lp - L)).reshape(1, Lp).astype(jnp.float32)
    return w_ih, w_hh, b, w_dec, b_dec


def sentiment_net_forward(inputs, params, *, return_sequence=False, time_chunk=None):
    """inputs: (B, T) int32 token ids.

    Returns logits (B, labels) like PyTorch's forward(); with return_sequence=True
    also returns the LSTM hidden sequence (B, T, H) (batch_first)."""
    emb = params["embedding"]                     # (V, E) f32 frozen table
    B, T = inputs.shape
    E = emb.shape[1]
    H = params["w_hh"].shape[1]                   # PyTorch layout (4H, H)
    L = params["w_dec"].shape[0]                  # PyTorch layout (L, H)

    # (8, 128)-aligned padded sizes.
    Bp = _round_up(max(B, 8), 8)
    Ep = _round_up(E, 128)
    Hp = _round_up(H, 128)
    Lp = _round_up(L, 128)

    # Batch blocking: only split when >=2 TensorCores exist (v7x) AND each block
    # stays a multiple of 16 rows (bf16 sublane-safe, MXU-friendly).  On single-TC
    # v5e/v6e a split just doubles the serial recurrence + grid-step overhead.
    if _num_tensorcores() >= 2 and Bp % 32 == 0:
        BB, NB = Bp // 2, 2
    else:
        BB, NB = Bp, 1

    # Time chunk budgeted against live VMEM: gates_in (f32, live across the whole
    # unrolled loop) capped at ~4 MiB, double-buffered x block at ~8 MiB.
    if time_chunk is not None:
        TC = int(time_chunk)
    else:
        TC = 32
        while TC > 8 and (TC * BB * 4 * Hp * 4 > (4 << 20)
                          or 2 * TC * BB * Ep * 2 > (8 << 20)):
            TC //= 2
    TC = max(1, min(TC, T))
    T_pad = _round_up(T, TC)                     # pad + mask instead of TC=1 fallback
    NT = T_pad // TC

    # Embedding gather directly into time-major layout.  Gather the f32 table and
    # cast only the gathered (T, B, E) slab (never rewrite the whole table).
    x_tm = jnp.take(emb, inputs.T, axis=0).astype(jnp.bfloat16)         # (T, B, E)
    x_tm = jnp.pad(x_tm, ((0, T_pad - T), (0, Bp - B), (0, Ep - E)))

    w_ih, w_hh, b, w_dec, b_dec = _prepare_weights(params, E, H, L, Ep, Hp, Lp)

    # Invariant weights: single-buffer once they are big enough for the extra
    # pipeline buffer to matter (realistic E~300, H~512-1024 -> several MiB bf16);
    # keep the default (well-trodden) pipelining for tiny weights.
    w_bytes = 2 * (Ep * 4 * Hp + Hp * 4 * Hp + Hp * Lp)
    weight_mode = (dict(pipeline_mode=pl.Buffered(1))
                   if w_bytes > (2 << 20) else {})

    kernel = _make_lstm_kernel(TC, BB, Hp, T, NT, return_sequence)

    in_specs = [
        pl.BlockSpec((TC, BB, Ep), lambda bb, tt: (tt, bb, 0)),                 # x chunk
        pl.BlockSpec((Ep, 4 * Hp), lambda bb, tt: (0, 0), **weight_mode),       # W_ih
        pl.BlockSpec((Hp, 4 * Hp), lambda bb, tt: (0, 0), **weight_mode),       # W_hh
        pl.BlockSpec((1, 4 * Hp), lambda bb, tt: (0, 0), **weight_mode),        # bias
        pl.BlockSpec((Hp, Lp), lambda bb, tt: (0, 0), **weight_mode),           # dec W
        pl.BlockSpec((1, Lp), lambda bb, tt: (0, 0), **weight_mode),            # dec b
    ]

    out_specs = []
    out_shapes = []
    if return_sequence:
        out_specs.append(pl.BlockSpec((TC, BB, Hp), lambda bb, tt: (tt, bb, 0)))
        out_shapes.append(jax.ShapeDtypeStruct((T_pad, Bp, Hp), jnp.bfloat16))
    out_specs.append(pl.BlockSpec((BB, Lp), lambda bb, tt: (bb, 0)))
    out_shapes.append(jax.ShapeDtypeStruct((Bp, Lp), jnp.float32))

    # Rightsized VMEM limit from actual need (blocks, weights, gates_in, scratch).
    need = (2 * TC * BB * Ep * 2                                  # x block (dbl-buf)
            + w_bytes * (1 if weight_mode else 2)
            + (4 * Hp + Lp) * 4 * 2                               # biases
            + (2 * TC * BB * Hp * 2 if return_sequence else 0)    # seq block (dbl-buf)
            + 2 * BB * Lp * 4                                     # logits block
            + 2 * BB * Hp * 4                                     # h/c scratch
            + TC * BB * 4 * Hp * 4)                               # gates_in live value
    vmem_limit = _pick_vmem_limit(need)

    outs = pl.pallas_call(
        kernel,
        out_shape=tuple(out_shapes),
        grid=(NB, NT),
        in_specs=in_specs,
        out_specs=tuple(out_specs),
        scratch_shapes=[
            pltpu.VMEM((BB, Hp), jnp.float32),   # h carry across time chunks
            pltpu.VMEM((BB, Hp), jnp.float32),   # c carry across time chunks
        ],
        compiler_params=pltpu.CompilerParams(
            dimension_semantics=("parallel", "arbitrary"),
            vmem_limit_bytes=vmem_limit),
    )(x_tm, w_ih, w_hh, b, w_dec, b_dec)

    if return_sequence:
        seq_pad, logits_pad = outs
        logits = logits_pad[:B, :L]
        out_seq = jnp.transpose(seq_pad[:T, :B, :H], (1, 0, 2)).astype(jnp.float32)
        return logits, out_seq
    (logits_pad,) = outs
    return logits_pad[:B, :L]


def reference_forward(inputs, params):
    """Pure-JAX reference mirroring the kernel's precision (bf16 matmuls, f32 state)."""
    x = jnp.take(params["embedding"], inputs, axis=0).astype(jnp.bfloat16)  # (B, T, E)
    B, T, _ = x.shape
    H = params["w_hh"].shape[1]
    w_ih = params["w_ih"].T.astype(jnp.bfloat16)       # (E, 4H), gate order (i, f, g, o)
    w_hh = params["w_hh"].T.astype(jnp.bfloat16)       # (H, 4H)
    b = (params["b_ih"] + params["b_hh"]).astype(jnp.float32)
    h = jnp.zeros((B, H), jnp.float32)
    c = jnp.zeros((B, H), jnp.float32)
    hs = []
    for t in range(T):
        g = (jnp.dot(x[:, t], w_ih, preferred_element_type=jnp.float32)
             + jnp.dot(h.astype(jnp.bfloat16), w_hh, preferred_element_type=jnp.float32)
             + b)
        i_g = jax.nn.sigmoid(g[:, 0 * H:1 * H])
        f_g = jax.nn.sigmoid(g[:, 1 * H:2 * H])
        g_g = jnp.tanh(g[:, 2 * H:3 * H])
        o_g = jax.nn.sigmoid(g[:, 3 * H:4 * H])
        c = f_g * c + i_g * g_g
        h = o_g * jnp.tanh(c)
        hs.append(h)
    logits = (jnp.dot(h.astype(jnp.bfloat16),
                      params["w_dec"].T.astype(jnp.bfloat16),
                      preferred_element_type=jnp.float32)
              + params["b_dec"])
    return logits, jnp.stack(hs, axis=1)               # (B, L), (B, T, H)


def init_params(key, vocab, embed_size, num_hiddens, labels):
    """PyTorch-layout parameters (Embedding, LSTM gate order i,f,g,o, Linear)."""
    k = jax.random.split(key, 7)
    s = 0.1
    return {
        "embedding": s * jax.random.normal(k[0], (vocab, embed_size), jnp.float32),
        "w_ih": s * jax.random.normal(k[1], (4 * num_hiddens, embed_size), jnp.float32),
        "w_hh": s * jax.random.normal(k[2], (4 * num_hiddens, num_hiddens), jnp.float32),
        "b_ih": s * jax.random.normal(k[3], (4 * num_hiddens,), jnp.float32),
        "b_hh": s * jax.random.normal(k[4], (4 * num_hiddens,), jnp.float32),
        "w_dec": s * jax.random.normal(k[5], (labels, num_hiddens), jnp.float32),
        "b_dec": s * jax.random.normal(k[6], (labels,), jnp.float32),
    }


if __name__ == "__main__":
    key = jax.random.PRNGKey(0)
    B, T = 2, 8            # batch, maxSelength
    V, E = 100, 32         # vocab (word_embed_size), embed_size
    H, L = 32, 2           # num_hiddens, labels (neg/pos)

    kp, ki = jax.random.split(key)
    params = init_params(kp, V, E, H, L)
    inputs = jax.random.randint(ki, (B, T), 1, V, dtype=jnp.int32)

    # Main path — matches PyTorch forward(): only the decoder logits.
    logits = sentiment_net_forward(inputs, params)
    logits = jax.block_until_ready(logits)
    assert logits.shape == (B, L)

    ref_logits, ref_seq = reference_forward(inputs, params)
    assert jnp.allclose(logits, ref_logits, atol=1e-3, rtol=1e-3)

    # Multi-chunk carry path + optional full hidden-state sequence output.
    logits2, out_seq = sentiment_net_forward(inputs, params,
                                             return_sequence=True, time_chunk=4)
    jax.block_until_ready((logits2, out_seq))
    assert out_seq.shape == (B, T, H)
    assert jnp.allclose(logits2, ref_logits, atol=1e-3, rtol=1e-3)
    assert jnp.allclose(out_seq, ref_seq, atol=2e-2, rtol=2e-2)

    # Non-divisible time chunk exercises the T-padding + masked tail-step path.
    logits3, out_seq3 = sentiment_net_forward(inputs, params,
                                              return_sequence=True, time_chunk=3)
    jax.block_until_ready((logits3, out_seq3))
    assert jnp.allclose(logits3, ref_logits, atol=1e-3, rtol=1e-3)
    assert jnp.allclose(out_seq3, ref_seq, atol=2e-2, rtol=2e-2)

    print("KERNEL_OK")
</pallas_src>

<mosaic_0001>
module attributes {stable_mosaic.version = 11 : i64} {
  func.func @kernel(%arg0: i32, %arg1: i32, %arg2: memref<8x8x128xbf16, #tpu.memory_space<vmem>>, %arg3: memref<128x512xbf16, #tpu.memory_space<vmem>>, %arg4: memref<128x512xbf16, #tpu.memory_space<vmem>>, %arg5: memref<1x512xf32, #tpu.memory_space<vmem>>, %arg6: memref<128x128xbf16, #tpu.memory_space<vmem>>, %arg7: memref<1x128xf32, #tpu.memory_space<vmem>>, %arg8: memref<8x128xf32, #tpu.memory_space<vmem>>, %arg9: memref<8x128xf32, #tpu.memory_space<vmem>>, %arg10: memref<8x128xf32, #tpu.memory_space<vmem>>) attributes {dimension_semantics = [#tpu.dimension_semantics<parallel>, #tpu.dimension_semantics<arbitrary>], iteration_bounds = array<i64: 1, 1>, scalar_prefetch = 0 : i64, scratch_operands = 2 : i64, tpu.core_type = #tpu.core_type<tc>, window_params = [{transform_indices = @transform_0, window_bounds = array<i64: 8, 8, 128>}, {pipeline_mode = #tpu.pipeline_mode<synchronous>, transform_indices = @transform_1, window_bounds = array<i64: 128, 512>}, {pipeline_mode = #tpu.pipeline_mode<synchronous>, transform_indices = @transform_2, window_bounds = array<i64: 128, 512>}, {pipeline_mode = #tpu.pipeline_mode<synchronous>, transform_indices = @transform_3, window_bounds = array<i64: 1, 512>}, {pipeline_mode = #tpu.pipeline_mode<synchronous>, transform_indices = @transform_4, window_bounds = array<i64: 128, 128>}, {pipeline_mode = #tpu.pipeline_mode<synchronous>, transform_indices = @transform_5, window_bounds = array<i64: 1, 128>}, {transform_indices = @transform_6, window_bounds = array<i64: 8, 128>}]} {
    %c0_i32 = arith.constant 0 : i32
    %0 = arith.cmpi eq, %arg1, %c0_i32 : i32
    %1 = arith.extui %0 : i1 to i32
    %c0_i32_0 = arith.constant 0 : i32
    %2 = arith.cmpi ne, %1, %c0_i32_0 : i32
    scf.if %2 {
      %cst_49 = arith.constant 0.000000e+00 : f32
      %185 = vector.broadcast %cst_49 : f32 to vector<8x128xf32>
      %c0_50 = arith.constant 0 : index
      %c0_51 = arith.constant 0 : index
      %186 = vector.load %arg9[%c0_50, %c0_51] : memref<8x128xf32, #tpu.memory_space<vmem>>, vector<8x128xf32>
      tpu.vector_store %arg9[%c0_50, %c0_51], %185 {strides = array<i32>} : memref<8x128xf32, #tpu.memory_space<vmem>>, vector<8x128xf32>,
      %cst_52 = arith.constant 0.000000e+00 : f32
      %187 = vector.broadcast %cst_52 : f32 to vector<8x128xf32>
      %c0_53 = arith.constant 0 : index
      %c0_54 = arith.constant 0 : index
      %188 = vector.load %arg10[%c0_53, %c0_54] : memref<8x128xf32, #tpu.memory_space<vmem>>, vector<8x128xf32>
      tpu.vector_store %arg10[%c0_53, %c0_54], %187 {strides = array<i32>} : memref<8x128xf32, #tpu.memory_space<vmem>>, vector<8x128xf32>,
    } else {
    }
    %c0 = arith.constant 0 : index
    %c0_1 = arith.constant 0 : index
    %c0_2 = arith.constant 0 : index
    %3 = vector.load %arg2[%c0, %c0_1, %c0_2] : memref<8x8x128xbf16, #tpu.memory_space<vmem>>, vector<8x8x128xbf16>
    %4 = vector.shape_cast %3 : vector<8x8x128xbf16> to vector<64x128xbf16>
    %c0_3 = arith.constant 0 : index
    %c0_4 = arith.constant 0 : index
    %5 = vector.load %arg3[%c0_3, %c0_4] : memref<128x512xbf16, #tpu.memory_space<vmem>>, vector<128x512xbf16>
    %cst = arith.constant dense<0.000000e+00> : vector<64x512xf32>
    %6 = tpu.matmul %4, %5, %cst {dimension_numbers = #tpu.dot_dimension_numbers<[1], [0], [0], [1], [0, 0, 1, 1], [], []>} : vector<64x128xbf16>, vector<128x512xbf16>, vector<64x512xf32> -> vector<64x512xf32>
    %c0_5 = arith.constant 0 : index
    %c0_6 = arith.constant 0 : index
    %7 = vector.load %arg5[%c0_5, %c0_6] : memref<1x512xf32, #tpu.memory_space<vmem>>, vector<1x512xf32>
    %8 = vector.broadcast %7 : vector<1x512xf32> to vector<64x512xf32>
    %9 = arith.addf %6, %8 : vector<64x512xf32>
    %c0_7 = arith.constant 0 : index
    %c0_8 = arith.constant 0 : index
    %10 = vector.load %arg9[%c0_7, %c0_8] : memref<8x128xf32, #tpu.memory_space<vmem>>, vector<8x128xf32>
    %c0_9 = arith.constant 0 : index
    %c0_10 = arith.constant 0 : index
    %11 = vector.load %arg10[%c0_9, %c0_10] : memref<8x128xf32, #tpu.memory_space<vmem>>, vector<8x128xf32>
    %12 = vector.extract_strided_slice %9 {offsets = [0, 0], sizes = [8, 512], strides = [1, 1]} : vector<64x512xf32> to vector<8x512xf32>
    %13 = arith.truncf %10 : vector<8x128xf32> to vector<8x128xbf16>
    %c0_11 = arith.constant 0 : index
    %c0_12 = arith.constant 0 : index
    %14 = vector.load %arg4[%c0_11, %c0_12] : memref<128x512xbf16, #tpu.memory_space<vmem>>, vector<128x512xbf16>
    %cst_13 = arith.constant dense<0.000000e+00> : vector<8x512xf32>
    %15 = tpu.matmul %13, %14, %cst_13 {dimension_numbers = #tpu.dot_dimension_numbers<[1], [0], [0], [1], [0, 0, 1, 1], [], []>} : vector<8x128xbf16>, vector<128x512xbf16>, vector<8x512xf32> -> vector<8x512xf32>
    %16 = arith.addf %12, %15 : vector<8x512xf32>
    %17 = vector.extract_strided_slice %16 {offsets = [0, 0], sizes = [8, 384], strides = [1, 1]} : vector<8x512xf32> to vector<8x384xf32>
    %18 = arith.negf %17 : vector<8x384xf32>
    %19 = math.exp %18 : vector<8x384xf32>
    %cst_14 = arith.constant 1.000000e+00 : f32
    %20 = vector.broadcast %cst_14 : f32 to vector<8x384xf32>
    %21 = arith.addf %20, %19 : vector<8x384xf32>
    %22 = arith.divf %20, %21 : vector<8x384xf32>
    %23 = vector.extract_strided_slice %22 {offsets = [0, 0], sizes = [8, 128], strides = [1, 1]} : vector<8x384xf32> to vector<8x128xf32>
    %24 = vector.extract_strided_slice %22 {offsets = [0, 128], sizes = [8, 128], strides = [1, 1]} : vector<8x384xf32> to vector<8x128xf32>
    %25 = vector.extract_strided_slice %22 {offsets = [0, 256], sizes = [8, 128], strides = [1, 1]} : vector<8x384xf32> to vector<8x128xf32>
    %26 = vector.extract_strided_slice %16 {offsets = [0, 384], sizes = [8, 128], strides = [1, 1]} : vector<8x512xf32> to vector<8x128xf32>
    %27 = math.tanh %26 : vector<8x128xf32>
    %28 = arith.mulf %24, %11 : vector<8x128xf32>
    %29 = arith.mulf %23, %27 : vector<8x128xf32>
    %30 = arith.addf %28, %29 : vector<8x128xf32>
    %31 = math.tanh %30 : vector<8x128xf32>
    %32 = arith.mulf %25, %31 : vector<8x128xf32>
    %33 = vector.extract_strided_slice %9 {offsets = [8, 0], sizes = [8, 512], strides = [1, 1]} : vector<64x512xf32> to vector<8x512xf32>
    %34 = arith.truncf %32 : vector<8x128xf32> to vector<8x128xbf16>
    %c0_15 = arith.constant 0 : index
    %c0_16 = arith.constant 0 : index
    %35 = vector.load %arg4[%c0_15, %c0_16] : memref<128x512xbf16, #tpu.memory_space<vmem>>, vector<128x512xbf16>
    %cst_17 = arith.constant dense<0.000000e+00> : vector<8x512xf32>
    %36 = tpu.matmul %34, %35, %cst_17 {dimension_numbers = #tpu.dot_dimension_numbers<[1], [0], [0], [1], [0, 0, 1, 1], [], []>} : vector<8x128xbf16>, vector<128x512xbf16>, vector<8x512xf32> -> vector<8x512xf32>
    %37 = arith.addf %33, %36 : vector<8x512xf32>
    %38 = vector.extract_strided_slice %37 {offsets = [0, 0], sizes = [8, 384], strides = [1, 1]} : vector<8x512xf32> to vector<8x384xf32>
    %39 = arith.negf %38 : vector<8x384xf32>
    %40 = math.exp %39 : vector<8x384xf32>
    %cst_18 = arith.constant 1.000000e+00 : f32
    %41 = vector.broadcast %cst_18 : f32 to vector<8x384xf32>
    %42 = arith.addf %41, %40 : vector<8x384xf32>
    %43 = arith.divf %41, %42 : vector<8x384xf32>
    %44 = vector.extract_strided_slice %43 {offsets = [0, 0], sizes = [8, 128], strides = [1, 1]} : vector<8x384xf32> to vector<8x128xf32>
    %45 = vector.extract_strided_slice %43 {offsets = [0, 128], sizes = [8, 128], strides = [1, 1]} : vector<8x384xf32> to vector<8x128xf32>
    %46 = vector.extract_strided_slice %43 {offsets = [0, 256], sizes = [8, 128], strides = [1, 1]} : vector<8x384xf32> to vector<8x128xf32>
    %47 = vector.extract_strided_slice %37 {offsets = [0, 384], sizes = [8, 128], strides = [1, 1]} : vector<8x512xf32> to vector<8x128xf32>
    %48 = math.tanh %47 : vector<8x128xf32>
    %49 = arith.mulf %45, %30 : vector<8x128xf32>
    %50 = arith.mulf %44, %48 : vector<8x128xf32>
    %51 = arith.addf %49, %50 : vector<8x128xf32>
    %52 = math.tanh %51 : vector<8x128xf32>
    %53 = arith.mulf %46, %52 : vector<8x128xf32>
    %54 = vector.extract_strided_slice %9 {offsets = [16, 0], sizes = [8, 512], strides = [1, 1]} : vector<64x512xf32> to vector<8x512xf32>
    %55 = arith.truncf %53 : vector<8x128xf32> to vector<8x128xbf16>
    %c0_19 = arith.constant 0 : index
    %c0_20 = arith.constant 0 : index
    %56 = vector.load %arg4[%c0_19, %c0_20] : memref<128x512xbf16, #tpu.memory_space<vmem>>, vector<128x512xbf16>
    %cst_21 = arith.constant dense<0.000000e+00> : vector<8x512xf32>
    %57 = tpu.matmul %55, %56, %cst_21 {dimension_numbers = #tpu.dot_dimension_numbers<[1], [0], [0], [1], [0, 0, 1, 1], [], []>} : vector<8x128xbf16>, vector<128x512xbf16>, vector<8x512xf32> -> vector<8x512xf32>
    %58 = arith.addf %54, %57 : vector<8x512xf32>
    %59 = vector.extract_strided_slice %58 {offsets = [0, 0], sizes = [8, 384], strides = [1, 1]} : vector<8x512xf32> to vector<8x384xf32>
    %60 = arith.negf %59 : vector<8x384xf32>
    %61 = math.exp %60 : vector<8x384xf32>
    %cst_22 = arith.constant 1.000000e+00 : f32
    %62 = vector.broadcast %cst_22 : f32 to vector<8x384xf32>
    %63 = arith.addf %62, %61 : vector<8x384xf32>
    %64 = arith.divf %62, %63 : vector<8x384xf32>
    %65 = vector.extract_strided_slice %64 {offsets = [0, 0], sizes = [8, 128], strides = [1, 1]} : vector<8x384xf32> to vector<8x128xf32>
    %66 = vector.extract_strided_slice %64 {offsets = [0, 128], sizes = [8, 128], strides = [1, 1]} : vector<8x384xf32> to vector<8x128xf32>
    %67 = vector.extract_strided_slice %64 {offsets = [0, 256], sizes = [8, 128], strides = [1, 1]} : vector<8x384xf32> to vector<8x128xf32>
    %68 = vector.extract_strided_slice %58 {offsets = [0, 384], sizes = [8, 128], strides = [1, 1]} : vector<8x512xf32> to vector<8x128xf32>
    %69 = math.tanh %68 : vector<8x128xf32>
    %70 = arith.mulf %66, %51 : vector<8x128xf32>
    %71 = arith.mulf %65, %69 : vector<8x128xf32>
    %72 = arith.addf %70, %71 : vector<8x128xf32>
    %73 = math.tanh %72 : vector<8x128xf32>
    %74 = arith.mulf %67, %73 : vector<8x128xf32>
    %75 = vector.extract_strided_slice %9 {offsets = [24, 0], sizes = [8, 512], strides = [1, 1]} : vector<64x512xf32> to vector<8x512xf32>
    %76 = arith.truncf %74 : vector<8x128xf32> to vector<8x128xbf16>
    %c0_23 = arith.constant 0 : index
    %c0_24 = arith.constant 0 : index
    %77 = vector.load %arg4[%c0_23, %c0_24] : memref<128x512xbf16, #tpu.memory_space<vmem>>, vector<128x512xbf16>
    %cst_25 = arith.constant dense<0.000000e+00> : vector<8x512xf32>
    %78 = tpu.matmul %76, %77, %cst_25 {dimension_numbers = #tpu.dot_dimension_numbers<[1], [0], [0], [1], [0, 0, 1, 1], [], []>} : vector<8x128xbf16>, vector<128x512xbf16>, vector<8x512xf32> -> vector<8x512xf32>
    %79 = arith.addf %75, %78 : vector<8x512xf32>
    %80 = vector.extract_strided_slice %79 {offsets = [0, 0], sizes = [8, 384], strides = [1, 1]} : vector<8x512xf32> to vector<8x384xf32>
    %81 = arith.negf %80 : vector<8x384xf32>
    %82 = math.exp %81 : vector<8x384xf32>
    %cst_26 = arith.constant 1.000000e+00 : f32
    %83 = vector.broadcast %cst_26 : f32 to vector<8x384xf32>
    %84 = arith.addf %83, %82 : vector<8x384xf32>
    %85 = arith.divf %83, %84 : vector<8x384xf32>
    %86 = vector.extract_strided_slice %85 {offsets = [0, 0], sizes = [8, 128], strides = [1, 1]} : vector<8x384xf32> to vector<8x128xf32>
    %87 = vector.extract_strided_slice %85 {offsets = [0, 128], sizes = [8, 128], strides = [1, 1]} : vector<8x384xf32> to vector<8x128xf32>
    %88 = vector.extract_strided_slice %85 {offsets = [0, 256], sizes = [8, 128], strides = [1, 1]} : vector<8x384xf32> to vector<8x128xf32>
    %89 = vector.extract_strided_slice %79 {offsets = [0, 384], sizes = [8, 128], strides = [1, 1]} : vector<8x512xf32> to vector<8x128xf32>
    %90 = math.tanh %89 : vector<8x128xf32>
    %91 = arith.mulf %87, %72 : vector<8x128xf32>
    %92 = arith.mulf %86, %90 : vector<8x128xf32>
    %93 = arith.addf %91, %92 : vector<8x128xf32>
    %94 = math.tanh %93 : vector<8x128xf32>
    %95 = arith.mulf %88, %94 : vector<8x128xf32>
    %96 = vector.extract_strided_slice %9 {offsets = [32, 0], sizes = [8, 512], strides = [1, 1]} : vector<64x512xf32> to vector<8x512xf32>
    %97 = arith.truncf %95 : vector<8x128xf32> to vector<8x128xbf16>
    %c0_27 = arith.constant 0 : index
    %c0_28 = arith.constant 0 : index
    %98 = vector.load %arg4[%c0_27, %c0_28] : memref<128x512xbf16, #tpu.memory_space<vmem>>, vector<128x512xbf16>
    %cst_29 = arith.constant dense<0.000000e+00> : vector<8x512xf32>
    %99 = tpu.matmul %97, %98, %cst_29 {dimension_numbers = #tpu.dot_dimension_numbers<[1], [0], [0], [1], [0, 0, 1, 1], [], []>} : vector<8x128xbf16>, vector<128x512xbf16>, vector<8x512xf32> -> vector<8x512xf32>
    %100 = arith.addf %96, %99 : vector<8x512xf32>
    %101 = vector.extract_strided_slice %100 {offsets = [0, 0], sizes = [8, 384], strides = [1, 1]} : vector<8x512xf32> to vector<8x384xf32>
    %102 = arith.negf %101 : vector<8x384xf32>
    %103 = math.exp %102 : vector<8x384xf32>
    %cst_30 = arith.constant 1.000000e+00 : f32
    %104 = vector.broadcast %cst_30 : f32 to vector<8x384xf32>
    %105 = arith.addf %104, %103 : vector<8x384xf32>
    %106 = arith.divf %104, %105 : vector<8x384xf32>
    %107 = vector.extract_strided_slice %106 {offsets = [0, 0], sizes = [8, 128], strides = [1, 1]} : vector<8x384xf32> to vector<8x128xf32>
    %108 = vector.extract_strided_slice %106 {offsets = [0, 128], sizes = [8, 128], strides = [1, 1]} : vector<8x384xf32> to vector<8x128xf32>
    %109 = vector.extract_strided_slice %106 {offsets = [0, 256], sizes = [8, 128], strides = [1, 1]} : vector<8x384xf32> to vector<8x128xf32>
    %110 = vector.extract_strided_slice %100 {offsets = [0, 384], sizes = [8, 128], strides = [1, 1]} : vector<8x512xf32> to vector<8x128xf32>
    %111 = math.tanh %110 : vector<8x128xf32>
    %112 = arith.mulf %108, %93 : vector<8x128xf32>
    %113 = arith.mulf %107, %111 : vector<8x128xf32>
    %114 = arith.addf %112, %113 : vector<8x128xf32>
    %115 = math.tanh %114 : vector<8x128xf32>
    %116 = arith.mulf %109, %115 : vector<8x128xf32>
    %117 = vector.extract_strided_slice %9 {offsets = [40, 0], sizes = [8, 512], strides = [1, 1]} : vector<64x512xf32> to vector<8x512xf32>
    %118 = arith.truncf %116 : vector<8x128xf32> to vector<8x128xbf16>
    %c0_31 = arith.constant 0 : index
    %c0_32 = arith.constant 0 : index
    %119 = vector.load %arg4[%c0_31, %c0_32] : memref<128x512xbf16, #tpu.memory_space<vmem>>, vector<128x512xbf16>
    %cst_33 = arith.constant dense<0.000000e+00> : vector<8x512xf32>
    %120 = tpu.matmul %118, %119, %cst_33 {dimension_numbers = #tpu.dot_dimension_numbers<[1], [0], [0], [1], [0, 0, 1, 1], [], []>} : vector<8x128xbf16>, vector<128x512xbf16>, vector<8x512xf32> -> vector<8x512xf32>
    %121 = arith.addf %117, %120 : vector<8x512xf32>
    %122 = vector.extract_strided_slice %121 {offsets = [0, 0], sizes = [8, 384], strides = [1, 1]} : vector<8x512xf32> to vector<8x384xf32>
    %123 = arith.negf %122 : vector<8x384xf32>
    %124 = math.exp %123 : vector<8x384xf32>
    %cst_34 = arith.constant 1.000000e+00 : f32
    %125 = vector.broadcast %cst_34 : f32 to vector<8x384xf32>
    %126 = arith.addf %125, %124 : vector<8x384xf32>
    %127 = arith.divf %125, %126 : vector<8x384xf32>
    %128 = vector.extract_strided_slice %127 {offsets = [0, 0], sizes = [8, 128], strides = [1, 1]} : vector<8x384xf32> to vector<8x128xf32>
    %129 = vector.extract_strided_slice %127 {offsets = [0, 128], sizes = [8, 128], strides = [1, 1]} : vector<8x384xf32> to vector<8x128xf32>
    %130 = vector.extract_strided_slice %127 {offsets = [0, 256], sizes = [8, 128], strides = [1, 1]} : vector<8x384xf32> to vector<8x128xf32>
    %131 = vector.extract_strided_slice %121 {offsets = [0, 384], sizes = [8, 128], strides = [1, 1]} : vector<8x512xf32> to vector<8x128xf32>
    %132 = math.tanh %131 : vector<8x128xf32>
    %133 = arith.mulf %129, %114 : vector<8x128xf32>
    %134 = arith.mulf %128, %132 : vector<8x128xf32>
    %135 = arith.addf %133, %134 : vector<8x128xf32>
    %136 = math.tanh %135 : vector<8x128xf32>
    %137 = arith.mulf %130, %136 : vector<8x128xf32>
    %138 = vector.extract_strided_slice %9 {offsets = [48, 0], sizes = [8, 512], strides = [1, 1]} : vector<64x512xf32> to vector<8x512xf32>
    %139 = arith.truncf %137 : vector<8x128xf32> to vector<8x128xbf16>
    %c0_35 = arith.constant 0 : index
    %c0_36 = arith.constant 0 : index
    %140 = vector.load %arg4[%c0_35, %c0_36] : memref<128x512xbf16, #tpu.memory_space<vmem>>, vector<128x512xbf16>
    %cst_37 = arith.constant dense<0.000000e+00> : vector<8x512xf32>
    %141 = tpu.matmul %139, %140, %cst_37 {dimension_numbers = #tpu.dot_dimension_numbers<[1], [0], [0], [1], [0, 0, 1, 1], [], []>} : vector<8x128xbf16>, vector<128x512xbf16>, vector<8x512xf32> -> vector<8x512xf32>
    %142 = arith.addf %138, %141 : vector<8x512xf32>
    %143 = vector.extract_strided_slice %142 {offsets = [0, 0], sizes = [8, 384], strides = [1, 1]} : vector<8x512xf32> to vector<8x384xf32>
    %144 = arith.negf %143 : vector<8x384xf32>
    %145 = math.exp %144 : vector<8x384xf32>
    %cst_38 = arith.constant 1.000000e+00 : f32
    %146 = vector.broadcast %cst_38 : f32 to vector<8x384xf32>
    %147 = arith.addf %146, %145 : vector<8x384xf32>
    %148 = arith.divf %146, %147 : vector<8x384xf32>
    %149 = vector.extract_strided_slice %148 {offsets = [0, 0], sizes = [8, 128], strides = [1, 1]} : vector<8x384xf32> to vector<8x128xf32>
    %150 = vector.extract_strided_slice %148 {offsets = [0, 128], sizes = [8, 128], strides = [1, 1]} : vector<8x384xf32> to vector<8x128xf32>
    %151 = vector.extract_strided_slice %148 {offsets = [0, 256], sizes = [8, 128], strides = [1, 1]} : vector<8x384xf32> to vector<8x128xf32>
    %152 = vector.extract_strided_slice %142 {offsets = [0, 384], sizes = [8, 128], strides = [1, 1]} : vector<8x512xf32> to vector<8x128xf32>
    %153 = math.tanh %152 : vector<8x128xf32>
    %154 = arith.mulf %150, %135 : vector<8x128xf32>
    %155 = arith.mulf %149, %153 : vector<8x128xf32>
    %156 = arith.addf %154, %155 : vector<8x128xf32>
    %157 = math.tanh %156 : vector<8x128xf32>
    %158 = arith.mulf %151, %157 : vector<8x128xf32>
    %159 = vector.extract_strided_slice %9 {offsets = [56, 0], sizes = [8, 512], strides = [1, 1]} : vector<64x512xf32> to vector<8x512xf32>
    %160 = arith.truncf %158 : vector<8x128xf32> to vector<8x128xbf16>
    %c0_39 = arith.constant 0 : index
    %c0_40 = arith.constant 0 : index
    %161 = vector.load %arg4[%c0_39, %c0_40] : memref<128x512xbf16, #tpu.memory_space<vmem>>, vector<128x512xbf16>
    %cst_41 = arith.constant dense<0.000000e+00> : vector<8x512xf32>
    %162 = tpu.matmul %160, %161, %cst_41 {dimension_numbers = #tpu.dot_dimension_numbers<[1], [0], [0], [1], [0, 0, 1, 1], [], []>} : vector<8x128xbf16>, vector<128x512xbf16>, vector<8x512xf32> -> vector<8x512xf32>
    %163 = arith.addf %159, %162 : vector<8x512xf32>
    %164 = vector.extract_strided_slice %163 {offsets = [0, 0], sizes = [8, 384], strides = [1, 1]} : vector<8x512xf32> to vector<8x384xf32>
    %165 = arith.negf %164 : vector<8x384xf32>
    %166 = math.exp %165 : vector<8x384xf32>
    %cst_42 = arith.constant 1.000000e+00 : f32
    %167 = vector.broadcast %cst_42 : f32 to vector<8x384xf32>
    %168 = arith.addf %167, %166 : vector<8x384xf32>
    %169 = arith.divf %167, %168 : vector<8x384xf32>
    %170 = vector.extract_strided_slice %169 {offsets = [0, 0], sizes = [8, 128], strides = [1, 1]} : vector<8x384xf32> to vector<8x128xf32>
    %171 = vector.extract_strided_slice %169 {offsets = [0, 128], sizes = [8, 128], strides = [1, 1]} : vector<8x384xf32> to vector<8x128xf32>
    %172 = vector.extract_strided_slice %169 {offsets = [0, 256], sizes = [8, 128], strides = [1, 1]} : vector<8x384xf32> to vector<8x128xf32>
    %173 = vector.extract_strided_slice %163 {offsets = [0, 384], sizes = [8, 128], strides = [1, 1]} : vector<8x512xf32> to vector<8x128xf32>
    %174 = math.tanh %173 : vector<8x128xf32>
    %175 = arith.mulf %171, %156 : vector<8x128xf32>
    %176 = arith.mulf %170, %174 : vector<8x128xf32>
    %177 = arith.addf %175, %176 : vector<8x128xf32>
    %178 = math.tanh %177 : vector<8x128xf32>
    %179 = arith.mulf %172, %178 : vector<8x128xf32>
    %c0_43 = arith.constant 0 : index
    %c0_44 = arith.constant 0 : index
    %180 = vector.load %arg9[%c0_43, %c0_44] : memref<8x128xf32, #tpu.memory_space<vmem>>, vector<8x128xf32>
    tpu.vector_store %arg9[%c0_43, %c0_44], %179 {strides = array<i32>} : memref<8x128xf32, #tpu.memory_space<vmem>>, vector<8x128xf32>,
    %c0_45 = arith.constant 0 : index
    %c0_46 = arith.constant 0 : index
    %181 = vector.load %arg10[%c0_45, %c0_46] : memref<8x128xf32, #tpu.memory_space<vmem>>, vector<8x128xf32>
    tpu.vector_store %arg10[%c0_45, %c0_46], %177 {strides = array<i32>} : memref<8x128xf32, #tpu.memory_space<vmem>>, vector<8x128xf32>,
    %c0_i32_47 = arith.constant 0 : i32
    %182 = arith.cmpi eq, %arg1, %c0_i32_47 : i32
    %183 = arith.extui %182 : i1 to i32
    %c0_i32_48 = arith.constant 0 : i32
    %184 = arith.cmpi ne, %183, %c0_i32_48 : i32
    scf.if %184 {
      %185 = arith.truncf %179 : vector<8x128xf32> to vector<8x128xbf16>
      %c0_49 = arith.constant 0 : index
      %c0_50 = arith.constant 0 : index
      %186 = vector.load %arg6[%c0_49, %c0_50] : memref<128x128xbf16, #tpu.memory_space<vmem>>, vector<128x128xbf16>
      %cst_51 = arith.constant dense<0.000000e+00> : vector<8x128xf32>
      %187 = tpu.matmul %185, %186, %cst_51 {dimension_numbers = #tpu.dot_dimension_numbers<[1], [0], [0], [1], [0, 0, 1, 1], [], []>} : vector<8x128xbf16>, vector<128x128xbf16>, vector<8x128xf32> -> vector<8x128xf32>
      %c0_52 = arith.constant 0 : index
      %c0_53 = arith.constant 0 : index
      %188 = vector.load %arg7[%c0_52, %c0_53] : memref<1x128xf32, #tpu.memory_space<vmem>>, vector<1x128xf32>
      %189 = vector.broadcast %188 : vector<1x128xf32> to vector<8x128xf32>
      %190 = arith.addf %187, %189 : vector<8x128xf32>
      %c0_54 = arith.constant 0 : index
      %c0_55 = arith.constant 0 : index
      %191 = vector.load %arg8[%c0_54, %c0_55] : memref<8x128xf32, #tpu.memory_space<vmem>>, vector<8x128xf32>
      tpu.vector_store %arg8[%c0_54, %c0_55], %190 {strides = array<i32>} : memref<8x128xf32, #tpu.memory_space<vmem>>, vector<8x128xf32>,
    } else {
    }
    return
  }
  func.func @transform_0(%arg0: i32, %arg1: i32) -> (i32, i32, i32) {
    %c0_i32 = arith.constant 0 : i32
    %c0_i32_0 = arith.constant 0 : i32
    return %arg1, %arg0, %c0_i32 : i32, i32, i32
  }
  func.func @transform_1(%arg0: i32, %arg1: i32) -> (i32, i32) {
    %c0_i32 = arith.constant 0 : i32
    %c0_i32_0 = arith.constant 0 : i32
    %c0_i32_1 = arith.constant 0 : i32
    return %c0_i32, %c0_i32_0 : i32, i32
  }
  func.func @transform_2(%arg0: i32, %arg1: i32) -> (i32, i32) {
    %c0_i32 = arith.constant 0 : i32
    %c0_i32_0 = arith.constant 0 : i32
    %c0_i32_1 = arith.constant 0 : i32
    return %c0_i32, %c0_i32_0 : i32, i32
  }
  func.func @transform_3(%arg0: i32, %arg1: i32) -> (i32, i32) {
    %c0_i32 = arith.constant 0 : i32
    %c0_i32_0 = arith.constant 0 : i32
    %c0_i32_1 = arith.constant 0 : i32
    return %c0_i32, %c0_i32_0 : i32, i32
  }
  func.func @transform_4(%arg0: i32, %arg1: i32) -> (i32, i32) {
    %c0_i32 = arith.constant 0 : i32
    %c0_i32_0 = arith.constant 0 : i32
    %c0_i32_1 = arith.constant 0 : i32
    return %c0_i32, %c0_i32_0 : i32, i32
  }
  func.func @transform_5(%arg0: i32, %arg1: i32) -> (i32, i32) {
    %c0_i32 = arith.constant 0 : i32
    %c0_i32_0 = arith.constant 0 : i32
    %c0_i32_1 = arith.constant 0 : i32
    return %c0_i32, %c0_i32_0 : i32, i32
  }
  func.func @transform_6(%arg0: i32, %arg1: i32) -> (i32, i32) {
    %c0_i32 = arith.constant 0 : i32
    %c0_i32_0 = arith.constant 0 : i32
    return %arg0, %c0_i32 : i32, i32
  }
}

</mosaic_0001>

<bundles_post_ra>
// kernel: tpu_custom_call.1
= control target key start
LH: loop header
LB: loop body
LE: loop exit
PB: predicated region body
PF: predicated region fallthrough
CT: control target
= control target key end

     0   :  { %11 = vsyncpa [#allocation5], 0  ;;  %s2873_s0 = inlined_call_operand.hbm [shape: bf16[8,8,128], index: 0, kind: input, shape index: {}]   ;;  %s2874_s1 = inlined_call_operand.hbm [shape: bf16[128,512], index: 1, kind: input, shape index: {}]   ;;  %s2875_s2 = inlined_call_operand.hbm [shape: bf16[128,512], index: 2, kind: input, shape index: {}]   ;;  %s2876_s3 = inlined_call_operand.vmem [shape: f32[1,512], index: 3, kind: input, shape index: {}]   ;;  %s2877_s4 = inlined_call_operand.hbm [shape: bf16[128,128], index: 4, kind: input, shape index: {}]   ;;  %s2878_s5 = inlined_call_operand.vmem [shape: f32[1,128], index: 5, kind: input, shape index: {}]   ;;  %s2879_s6 = inlined_call_operand.hbm [shape: f32[8,128], index: 6, kind: output, shape index: {}]  }
   0x1   :  { %12 = vsyncpa [#allocation8], 0 }
   0x2   :  { %13 = vsyncpa [#allocation11], 0 }
   0x3   :  { %14 = vsyncpa [#allocation6], 0  ;;  %s2224_s21 = smov [#allocation7]   ;;  %s2106_s25 = scalar_lea.hbm %s2874_s1, 4096 }
   0x4   :  { %s32_s22 = sshll.u32 %s2224_s21, 4  ;;  %p2107_p0 = scmp.ne.s32.totalorder %s2874_s1, %s2106_s25  ;;  %s33_s22 = int_to_ptr.vmem [resolvable:$true] %s32_s22 }
   0x5   :  { %p2110_p1 = scmp.lt.u32.totalorder %s2106_s25, %s2874_s1 }
   0x7   :  { %p2112_p2 = pnand %p2110_p1, %p2107_p0 }
   0x9   :  { %2115 = shalt.err (!%p2112_p2)
}
   0xa   :  { %s2116_s30 = scalar_lea.vmem %s33_s22, 4096  ;;  %p2121_p4 = scmp.lt.s32.totalorder %s33_s22, %s33_s22 }
   0xb   :  { %p2117_p3 = scmp.ne.s32.totalorder %s33_s22, %s2116_s30  ;;  %p2122_p5 = scmp.lt.s32.totalorder %s2116_s30, %s2116_s30 }
   0xd   :  { %p2123_p6 = por %p2122_p5, %p2121_p4 }
   0xf   :  { %p2124_p7 = pnand %p2123_p6, %p2117_p3 }
  0x11   :  { %2127 = shalt.err (!%p2124_p7)
}
  0x12   :  { %s2225_s7 = smov 256   ;;  %s2226_s8 = smov 16  }
  0x13   :  { %38 = dma.hbm_to_vmem [thread:$0]  %s2874_s1, 4096, %s33_s22, [#allocation8], %s2225_s7, %s2225_s7, %s2226_s8  }
  0x14   :  { %s2227_s11 = smov [#allocation4]   ;;  %s2128_s15 = scalar_lea.hbm %s2873_s0, 512 }
  0x15   :  { %s20_s12 = sshll.u32 %s2227_s11, 4  ;;  %p2129_p8 = scmp.ne.s32.totalorder %s2873_s0, %s2128_s15  ;;  %s21_s12 = int_to_ptr.vmem [resolvable:$true] %s20_s12 }
  0x16   :  { %p2132_p9 = scmp.lt.u32.totalorder %s2128_s15, %s2873_s0 }
  0x18   :  { %p2134_p10 = pnand %p2132_p9, %p2129_p8 }
  0x1a   :  { %2137 = shalt.err (!%p2134_p10)
}
  0x1b   :  { %s2138_s20 = scalar_lea.vmem %s21_s12, 512  ;;  %p2143_p12 = scmp.lt.s32.totalorder %s21_s12, %s21_s12 }
  0x1c   :  { %p2139_p11 = scmp.ne.s32.totalorder %s21_s12, %s2138_s20  ;;  %p2144_p13 = scmp.lt.s32.totalorder %s2138_s20, %s2138_s20 }
  0x1e   :  { %p2145_p0 = por %p2144_p13, %p2143_p12 }
  0x20   :  { %p2146_p1 = pnand %p2145_p0, %p2139_p11 }
  0x22   :  { %2149 = shalt.err (!%p2146_p1)
}
  0x23   :  { %s2228_s1 = smov 64   ;;  %s2229_s21 = smov 4  }
  0x24   :  { %26 = dma.hbm_to_vmem [thread:$0]  %s2873_s0, 512, %s21_s12, [#allocation5], %s2228_s1, %s2228_s1, %s2229_s21  }
  0x25   :  { %s2230_s24 = smov [#allocation9]   ;;  %s2231_s26 = smov [#allocation10]  }
  0x26   :  { %s44_s25 = sshll.u32 %s2230_s24, 4  ;;  %s58_s27 = sshll.u32 %s2231_s26, 4  ;;  %s45_s25 = int_to_ptr.vmem [resolvable:$true] %s44_s25  ;;  %s2302_s27 = int_to_ptr.vmem [resolvable:$true] %s58_s27 }
  0x27   :  { %s2150_s30 = scalar_lea.hbm %s2875_s2, 4096 }
  0x28   :  { %p2151_p2 = scmp.ne.s32.totalorder %s2875_s2, %s2150_s30  ;;  %p2154_p3 = scmp.lt.u32.totalorder %s2150_s30, %s2875_s2 }
  0x2a   :  { %p2156_p4 = pnand %p2154_p3, %p2151_p2 }
  0x2c   :  { %2159 = shalt.err (!%p2156_p4)
}
  0x2d   :  { %s2160_s0 = scalar_lea.vmem %s45_s25, 4096  ;;  %p2165_p6 = scmp.lt.s32.totalorder %s45_s25, %s45_s25 }
  0x2e   :  { %p2161_p5 = scmp.ne.s32.totalorder %s45_s25, %s2160_s0  ;;  %p2166_p7 = scmp.lt.s32.totalorder %s2160_s0, %s2160_s0 }
  0x30   :  { %p2167_p8 = por %p2166_p7, %p2165_p6 }
  0x32   :  { %p2168_p9 = pnand %p2167_p8, %p2161_p5 }
  0x34   :  { %2171 = shalt.err (!%p2168_p9)
}
  0x35   :  { %50 = dma.hbm_to_vmem [thread:$0]  %s2875_s2, 4096, %s45_s25, [#allocation8], %s2225_s7, %s2225_s7, %s2226_s8  }
  0x36   :  { %s2172_s17 = scalar_lea.hbm %s2877_s4, 1024 }
  0x37   :  { %p2173_p10 = scmp.ne.s32.totalorder %s2877_s4, %s2172_s17  ;;  %p2176_p11 = scmp.lt.u32.totalorder %s2172_s17, %s2877_s4 }
  0x39   :  { %p2178_p12 = pnand %p2176_p11, %p2173_p10 }
  0x3b   :  { %2181 = shalt.err (!%p2178_p12)
}
  0x3c   :  { %s2182_s23 = scalar_lea.vmem %s2302_s27, 1024  ;;  %p2187_p0 = scmp.lt.s32.totalorder %s2302_s27, %s2302_s27 }
  0x3d   :  { %p2183_p13 = scmp.ne.s32.totalorder %s2302_s27, %s2182_s23  ;;  %p2188_p1 = scmp.lt.s32.totalorder %s2182_s23, %s2182_s23 }
  0x3f   :  { %p2189_p2 = por %p2188_p1, %p2187_p0 }
  0x41   :  { %p2190_p3 = pnand %p2189_p2, %p2183_p13 }
  0x43   :  { %2193 = shalt.err (!%p2190_p3)
}
  0x44   :  { %64 = dma.hbm_to_vmem [thread:$0]  %s2877_s4, 1024, %s2302_s27, [#allocation11], %s2228_s1, %s2228_s1, %s2229_s21  }
  0x45   :  { %2216 = dma.done.wait [#allocation5], 512  }
  0x46   :  { %2217 = vsyncadd [#allocation5], 4294966784 }
  0x47   :  { %2218 = dma.done.wait [#allocation8], 8192  }
  0x48   :  { %2219 = vsyncadd [#allocation8], 4294959104 }
  0x49   :  { %2220 = dma.done.wait [#allocation11], 1024  }
  0x4a   :  { %2221 = vsyncadd [#allocation11], 4294966272  ;;  %v2880_v0 = vmov 0   ;;  %v1838_v1 = vld [vmem:[#allocation7 + $0x4] ss:$16 sps:$4 sm:$0xff]   ;;  %v1899_v44 = vld [vmem:[#allocation4 + $0x8] sm:$0xff]  }
  0x4b   :  { %364 = vmatprep.mubr.bf16.mxu0 %v2880_v0  ;;  %437 = vmatprep.mubr.bf16.mxu1 %v2880_v0  ;;  %v1840_v2 = vld [vmem:[#allocation7 + $0xc] ss:$16 sps:$4 sm:$0xff]   ;;  %v1842_v3 = vld [vmem:[#allocation7] ss:$16 sps:$4 sm:$0xff]   ;;  %v1843_v4 = vld [vmem:[#allocation7 + $0x8] ss:$16 sps:$4 sm:$0xff]  }
  0x4c   :  { %332 = vmatprep.subr.bf16.mxu0 %v1838_v1  ;;  %405 = vmatprep.subr.bf16.mxu1 %v1840_v2  ;;  %v1844_v5 = vld [vmem:[#allocation7 + $0x24] ss:$16 sps:$4 sm:$0xff]   ;;  %v1846_v6 = vld [vmem:[#allocation7 + $0x2c] ss:$16 sps:$4 sm:$0xff]   ;;  %v1848_v7 = vld [vmem:[#allocation7 + $0x20] ss:$16 sps:$4 sm:$0xff]  }
  0x4d   :  { %333 = vmatpush1.bf16.msra.mxu0 %v1842_v3  ;;  %406 = vmatpush1.bf16.msra.mxu1 %v1843_v4  ;;  %v1849_v8 = vld [vmem:[#allocation7 + $0x28] ss:$16 sps:$4 sm:$0xff]   ;;  %v1850_v9 = vld [vmem:[#allocation7 + $0x44] ss:$16 sps:$4 sm:$0xff]   ;;  %v1852_v10 = vld [vmem:[#allocation7 + $0x4c] ss:$16 sps:$4 sm:$0xff]  }
  0x4e   :  { %334 = vmatprep.subr.bf16.mxu0 %v1844_v5  ;;  %407 = vmatprep.subr.bf16.mxu1 %v1846_v6  ;;  %v1854_v11 = vld [vmem:[#allocation7 + $0x40] ss:$16 sps:$4 sm:$0xff]   ;;  %v1855_v12 = vld [vmem:[#allocation7 + $0x48] ss:$16 sps:$4 sm:$0xff]   ;;  %v1856_v13 = vld [vmem:[#allocation7 + $0x64] ss:$16 sps:$4 sm:$0xff]  }
  0x4f   :  { %v1858_v14 = vld [vmem:[#allocation7 + $0x6c] ss:$16 sps:$4 sm:$0xff]   ;;  %v1860_v15 = vld [vmem:[#allocation7 + $0x60] ss:$16 sps:$4 sm:$0xff]   ;;  %v1861_v16 = vld [vmem:[#allocation7 + $0x68] ss:$16 sps:$4 sm:$0xff]  }
  0x50   :  { %v1862_v17 = vld [vmem:[#allocation7 + $0x84] ss:$16 sps:$4 sm:$0xff]   ;;  %v1864_v18 = vld [vmem:[#allocation7 + $0x8c] ss:$16 sps:$4 sm:$0xff]   ;;  %v1866_v19 = vld [vmem:[#allocation7 + $0x80] ss:$16 sps:$4 sm:$0xff]  }
  0x51   :  { %335 = vmatpush1.bf16.msra.mxu0 %v1848_v7  ;;  %408 = vmatpush1.bf16.msra.mxu1 %v1849_v8  ;;  %v1867_v20 = vld [vmem:[#allocation7 + $0x88] ss:$16 sps:$4 sm:$0xff]   ;;  %v1868_v21 = vld [vmem:[#allocation7 + $0xa4] ss:$16 sps:$4 sm:$0xff]   ;;  %v1870_v22 = vld [vmem:[#allocation7 + $0xac] ss:$16 sps:$4 sm:$0xff]   ;;  %v128_v7 = vlaneseq }
  0x52   :  { %336 = vmatprep.subr.bf16.mxu0 %v1850_v9  ;;  %409 = vmatprep.subr.bf16.mxu1 %v1852_v10  ;;  %v1872_v23 = vld [vmem:[#allocation7 + $0xa0] ss:$16 sps:$4 sm:$0xff]   ;;  %v1873_v24 = vld [vmem:[#allocation7 + $0xa8] ss:$16 sps:$4 sm:$0xff]   ;;  %v1874_v25 = vld [vmem:[#allocation7 + $0xc4] ss:$16 sps:$4 sm:$0xff]  }
  0x53   :  { %v1876_v26 = vld [vmem:[#allocation7 + $0xcc] ss:$16 sps:$4 sm:$0xff]   ;;  %v1878_v27 = vld [vmem:[#allocation7 + $0xc0] ss:$16 sps:$4 sm:$0xff]   ;;  %v1879_v28 = vld [vmem:[#allocation7 + $0xc8] ss:$16 sps:$4 sm:$0xff]  }
  0x54   :  { %v1880_v29 = vld [vmem:[#allocation7 + $0xe4] ss:$16 sps:$4 sm:$0xff]   ;;  %v1882_v30 = vld [vmem:[#allocation7 + $0xec] ss:$16 sps:$4 sm:$0xff]   ;;  %v1884_v31 = vld [vmem:[#allocation7 + $0xe0] ss:$16 sps:$4 sm:$0xff]  }
  0x55   :  { %337 = vmatpush1.bf16.msra.mxu0 %v1854_v11  ;;  %410 = vmatpush1.bf16.msra.mxu1 %v1855_v12  ;;  %v1885_v32 = vld [vmem:[#allocation7 + $0xe8] ss:$16 sps:$4 sm:$0xff]   ;;  %v2341_v33 = vld [vmem:[#allocation9 + $0x4] ss:$16 sps:$4 sm:$0xff]   ;;  %v2343_v34 = vld [vmem:[#allocation9 + $0xc] ss:$16 sps:$4 sm:$0xff]  }
  0x56   :  { %338 = vmatprep.subr.bf16.mxu0 %v1856_v13  ;;  %411 = vmatprep.subr.bf16.mxu1 %v1858_v14  ;;  %v1886_v35 = vld [vmem:[#allocation4] sm:$0xff]   ;;  %v2347_v37 = vld [vmem:[#allocation9 + $0x8] ss:$16 sps:$4 sm:$0xff]   ;;  %v2353_v39 = vld [vmem:[#allocation9 + $0x2c] ss:$16 sps:$4 sm:$0xff]   ;;  %v2233_v6 = vmov 0.0|0.0  }
  0x57   :  { %v2345_v36 = vld [vmem:[#allocation9] ss:$16 sps:$4 sm:$0xff]   ;;  %v2351_v38 = vld [vmem:[#allocation9 + $0x24] ss:$16 sps:$4 sm:$0xff]   ;;  %v2359_v41 = vld [vmem:[#allocation9 + $0x28] ss:$16 sps:$4 sm:$0xff]  }
  0x58   :  { %v2355_v40 = vld [vmem:[#allocation9 + $0x20] ss:$16 sps:$4 sm:$0xff]   ;;  %v2363_v42 = vld [vmem:[#allocation9 + $0x44] ss:$16 sps:$4 sm:$0xff]   ;;  %v2365_v43 = vld [vmem:[#allocation9 + $0x4c] ss:$16 sps:$4 sm:$0xff]  }
  0x59   :  { %339 = vmatpush1.bf16.msra.mxu0 %v1860_v15  ;;  %412 = vmatpush1.bf16.msra.mxu1 %v1861_v16  ;;  %v2369_v45 = vld [vmem:[#allocation9 + $0x40] ss:$16 sps:$4 sm:$0xff]   ;;  %v2371_v46 = vld [vmem:[#allocation9 + $0x48] ss:$16 sps:$4 sm:$0xff]   ;;  %v2375_v47 = vld [vmem:[#allocation9 + $0x64] ss:$16 sps:$4 sm:$0xff]  }
  0x5a   :  { %340 = vmatprep.subr.bf16.mxu0 %v1862_v17  ;;  %413 = vmatprep.subr.bf16.mxu1 %v1864_v18  ;;  %v2379_v48 = vld [vmem:[#allocation9 + $0x6c] ss:$16 sps:$4 sm:$0xff]   ;;  %v2381_v49 = vld [vmem:[#allocation9 + $0x60] ss:$16 sps:$4 sm:$0xff]   ;;  %v2383_v50 = vld [vmem:[#allocation9 + $0x68] ss:$16 sps:$4 sm:$0xff]  }
  0x5b   :  { %v2387_v51 = vld [vmem:[#allocation9 + $0x84] ss:$16 sps:$4 sm:$0xff]   ;;  %v2391_v52 = vld [vmem:[#allocation9 + $0x8c] ss:$16 sps:$4 sm:$0xff]   ;;  %v2395_v54 = vld [vmem:[#allocation9 + $0x80] ss:$16 sps:$4 sm:$0xff]  }
  0x5c   :  { %v1912_v53 = vld [vmem:[#allocation4 + $0x10] sm:$0xff]   ;;  %v2397_v55 = vld [vmem:[#allocation9 + $0x88] ss:$16 sps:$4 sm:$0xff]   ;;  %v2401_v57 = vld [vmem:[#allocation9 + $0xac] ss:$16 sps:$4 sm:$0xff]   ;;  %v129_v8 = vshrl.u32 %v128_v7, 7 }
  0x5d   :  { %341 = vmatpush1.bf16.msra.mxu0 %v1866_v19  ;;  %414 = vmatpush1.bf16.msra.mxu1 %v1867_v20  ;;  %v2399_v56 = vld [vmem:[#allocation9 + $0xa4] ss:$16 sps:$4 sm:$0xff]   ;;  %v2409_v58 = vld [vmem:[#allocation9 + $0xa0] ss:$16 sps:$4 sm:$0xff]   ;;  %v2411_v59 = vld [vmem:[#allocation9 + $0xa8] ss:$16 sps:$4 sm:$0xff]  }
  0x5e   :  { %342 = vmatprep.subr.bf16.mxu0 %v1868_v21  ;;  %415 = vmatprep.subr.bf16.mxu1 %v1870_v22  ;;  %v2415_v60 = vld [vmem:[#allocation9 + $0xc4] ss:$16 sps:$4 sm:$0xff]   ;;  %v2417_v61 = vld [vmem:[#allocation9 + $0xcc] ss:$16 sps:$4 sm:$0xff]   ;;  %v2423_v63 = vld [vmem:[#allocation9 + $0xc0] ss:$16 sps:$4 sm:$0xff]  }
  0x5f   :  { %v1925_v62 = vld [vmem:[#allocation4 + $0x18] sm:$0xff]   ;;  %v2429_v2 = vld [vmem:[#allocation9 + $0xe4] ss:$16 sps:$4 sm:$0xff]   ;;  %v2435_v4 = vld [vmem:[#allocation9 + $0xe0] ss:$16 sps:$4 sm:$0xff]   ;;  %v138_v9 = vsub.s32 2, %v129_v8 }
  0x60   :  { %v2425_v1 = vld [vmem:[#allocation9 + $0xc8] ss:$16 sps:$4 sm:$0xff]   ;;  %v2431_v3 = vld [vmem:[#allocation9 + $0xec] ss:$16 sps:$4 sm:$0xff]   ;;  %v142_v10 = vsub.s32 3, %v129_v8  ;;  %v130_v11 = vsub.s32 0, %v129_v8 }
  0x61   :  { %343 = vmatpush1.bf16.msra.mxu0 %v1872_v23  ;;  %416 = vmatpush1.bf16.msra.mxu1 %v1873_v24  ;;  %v2437_v5 = vld [vmem:[#allocation9 + $0xe8] ss:$16 sps:$4 sm:$0xff]   ;;  %v126_v12 = vld [vmem:[%s2876_s3] sm:$0xf]  ;;  %v134_v13 = vsub.s32 1, %v129_v8  ;;  %vm2235_vm0 = vmmov 0  }
  0x62   :  { %344 = vmatprep.subr.bf16.mxu0 %v1874_v25  ;;  %417 = vmatprep.subr.bf16.mxu1 %v1876_v26  ;;  %v2484_v14 = vrot.slane %v126_v12, %v138_v9  ;;  %v2490_v17 = vrot.slane %v126_v12, %v142_v10  ;;  %v131_v18 = vrot.slane %v126_v12, %v130_v11  ;;  %s2236_s21 = smov [#allocation12]  }
  0x63   :  { %v135_v21 = vrot.slane %v126_v12, %v134_v13  ;;  %s1684_s24 = sshll.u32 %s2236_s21, 4  ;;  %s1685_s24 = int_to_ptr.vmem [resolvable:$true] %s1684_s24 }
  0x64   :  { %s2194_s25 = scalar_lea.vmem %s1685_s24, 128  ;;  %p2199_p5 = scmp.lt.s32.totalorder %s1685_s24, %s1685_s24 }
  0x65   :  { %345 = vmatpush1.bf16.msra.mxu0 %v1878_v27  ;;  %418 = vmatpush1.bf16.msra.mxu1 %v1879_v28  ;;  %p2195_p4 = scmp.ne.s32.totalorder %s1685_s24, %s2194_s25  ;;  %p2200_p6 = scmp.lt.s32.totalorder %s2194_s25, %s2194_s25 }
  0x66   :  { %346 = vmatprep.subr.bf16.mxu0 %v1880_v29  ;;  %419 = vmatprep.subr.bf16.mxu1 %v1882_v30 }
  0x67   :  { %p2201_p7 = por %p2200_p6, %p2199_p5 }
  0x69   :  { %347 = vmatpush1.bf16.msra.mxu0 %v1884_v31  ;;  %420 = vmatpush1.bf16.msra.mxu1 %v1885_v32  ;;  %p2202_p8 = pnand %p2201_p7, %p2195_p4 }
  0x6a   :  { %673 = vmatprep.subr.bf16.mxu0 %v2341_v33  ;;  %714 = vmatprep.subr.bf16.mxu1 %v2343_v34 }
  0x6c   :  { %365 = vmatmul.mubr.bf16.vlgmr.msra.gmra.mrb[0].mxu0 %v1886_v35  ;;  %438 = vmatmul.mubr.bf16.vlgmr.msra.gmra.mrb[0].mxu1 %v1886_v35 }
  0x6d   :  { %674 = vmatpush1.bf16.msra.mxu0 %v2345_v36  ;;  %715 = vmatpush1.bf16.msra.mxu1 %v2347_v37 }
  0x6e   :  { %675 = vmatprep.subr.bf16.mxu0 %v2351_v38  ;;  %716 = vmatprep.subr.bf16.mxu1 %v2353_v39 }
  0x6f   :  { %374 = vmatprep.mubr.bf16.mxu0 %v2880_v0  ;;  %447 = vmatprep.mubr.bf16.mxu1 %v2880_v0 }
  0x71   :  { %676 = vmatpush1.bf16.msra.mxu0 %v2355_v40  ;;  %717 = vmatpush1.bf16.msra.mxu1 %v2359_v41 }
  0x72   :  { %677 = vmatprep.subr.bf16.mxu0 %v2363_v42  ;;  %718 = vmatprep.subr.bf16.mxu1 %v2365_v43 }
  0x74   :  { %375 = vmatmul.mubr.bf16.gmra.mrb[4].mxu0 %v1899_v44  ;;  %448 = vmatmul.mubr.bf16.gmra.mrb[4].mxu1 %v1899_v44 }
  0x75   :  { %678 = vmatpush1.bf16.msra.mxu0 %v2369_v45  ;;  %719 = vmatpush1.bf16.msra.mxu1 %v2371_v46 }
  0x76   :  { %679 = vmatprep.subr.bf16.mxu0 %v2375_v47  ;;  %720 = vmatprep.subr.bf16.mxu1 %v2379_v48 }
  0x77   :  { %384 = vmatprep.mubr.bf16.mxu0 %v2880_v0  ;;  %457 = vmatprep.mubr.bf16.mxu1 %v2880_v0 }
  0x79   :  { %680 = vmatpush1.bf16.msra.mxu0 %v2381_v49  ;;  %721 = vmatpush1.bf16.msra.mxu1 %v2383_v50 }
  0x7a   :  { %681 = vmatprep.subr.bf16.mxu0 %v2387_v51  ;;  %722 = vmatprep.subr.bf16.mxu1 %v2391_v52 }
  0x7c   :  { %385 = vmatmul.mubr.bf16.gmra.mrb[8].mxu0 %v1912_v53  ;;  %458 = vmatmul.mubr.bf16.gmra.mrb[8].mxu1 %v1912_v53 }
  0x7d   :  { %682 = vmatpush1.bf16.msra.mxu0 %v2395_v54  ;;  %723 = vmatpush1.bf16.msra.mxu1 %v2397_v55 }
  0x7e   :  { %683 = vmatprep.subr.bf16.mxu0 %v2399_v56  ;;  %724 = vmatprep.subr.bf16.mxu1 %v2401_v57 }
  0x7f   :  { %394 = vmatprep.mubr.bf16.mxu0 %v2880_v0  ;;  %467 = vmatprep.mubr.bf16.mxu1 %v2880_v0 }
  0x81   :  { %684 = vmatpush1.bf16.msra.mxu0 %v2409_v58  ;;  %725 = vmatpush1.bf16.msra.mxu1 %v2411_v59 }
  0x82   :  { %685 = vmatprep.subr.bf16.mxu0 %v2415_v60  ;;  %726 = vmatprep.subr.bf16.mxu1 %v2417_v61 }
  0x84   :  { %395 = vmatmul.mubr.bf16.gmra.mrb[12].mxu0 %v1925_v62  ;;  %468 = vmatmul.mubr.bf16.gmra.mrb[12].mxu1 %v1925_v62 }
  0x85   :  { %686 = vmatpush1.bf16.msra.mxu0 %v2423_v63  ;;  %727 = vmatpush1.bf16.msra.mxu1 %v2425_v1 }
  0x86   :  { %687 = vmatprep.subr.bf16.mxu0 %v2429_v2  ;;  %728 = vmatprep.subr.bf16.mxu1 %v2431_v3 }
  0x87   :  { %705 = vmatprep.mubr.bf16.mxu0 %v2880_v0  ;;  %746 = vmatprep.mubr.bf16.mxu1 %v2880_v0 }
  0x89   :  { %688 = vmatpush1.bf16.msra.mxu0 %v2435_v4  ;;  %729 = vmatpush1.bf16.msra.mxu1 %v2437_v5 }
  0x8a   :  { %784 = vmatprep.subr.bf16.mxu0 %v2341_v33  ;;  %825 = vmatprep.subr.bf16.mxu1 %v2343_v34 }
  0x8c   :  { %706 = vmatmul.mubr.bf16.vlgmr.msra.gmra.mrb[16].mxu0 %v2233_v6  ;;  %747 = vmatmul.mubr.bf16.vlgmr.msra.gmra.mrb[16].mxu1 %v2233_v6 }
  0x8d   :  { %785 = vmatpush1.bf16.msra.mxu0 %v2345_v36  ;;  %826 = vmatpush1.bf16.msra.mxu1 %v2347_v37 }
  0x8e   :  { %786 = vmatprep.subr.bf16.mxu0 %v2351_v38  ;;  %827 = vmatprep.subr.bf16.mxu1 %v2353_v39 }
  0x8f   :  { %816 = vmatprep.mubr.bf16.mxu0 %v2880_v0  ;;  %857 = vmatprep.mubr.bf16.mxu1 %v2880_v0 }
  0x91   :  { %787 = vmatpush1.bf16.msra.mxu0 %v2355_v40  ;;  %828 = vmatpush1.bf16.msra.mxu1 %v2359_v41 }
  0x92   :  { %788 = vmatprep.subr.bf16.mxu0 %v2363_v42  ;;  %829 = vmatprep.subr.bf16.mxu1 %v2365_v43 }
  0x95   :  { %789 = vmatpush1.bf16.msra.mxu0 %v2369_v45  ;;  %830 = vmatpush1.bf16.msra.mxu1 %v2371_v46 }
  0x96   :  { %790 = vmatprep.subr.bf16.mxu0 %v2375_v47  ;;  %831 = vmatprep.subr.bf16.mxu1 %v2379_v48 }
  0x99   :  { %791 = vmatpush1.bf16.msra.mxu0 %v2381_v49  ;;  %832 = vmatpush1.bf16.msra.mxu1 %v2383_v50 }
  0x9a   :  { %792 = vmatprep.subr.bf16.mxu0 %v2387_v51  ;;  %833 = vmatprep.subr.bf16.mxu1 %v2391_v52 }
  0x9d   :  { %793 = vmatpush1.bf16.msra.mxu0 %v2395_v54  ;;  %834 = vmatpush1.bf16.msra.mxu1 %v2397_v55 }
  0x9e   :  { %794 = vmatprep.subr.bf16.mxu0 %v2399_v56  ;;  %835 = vmatprep.subr.bf16.mxu1 %v2401_v57 }
  0xa1   :  { %795 = vmatpush1.bf16.msra.mxu0 %v2409_v58  ;;  %836 = vmatpush1.bf16.msra.mxu1 %v2411_v59 }
  0xa2   :  { %796 = vmatprep.subr.bf16.mxu0 %v2415_v60  ;;  %837 = vmatprep.subr.bf16.mxu1 %v2417_v61 }
  0xa5   :  { %797 = vmatpush1.bf16.msra.mxu0 %v2423_v63  ;;  %838 = vmatpush1.bf16.msra.mxu1 %v2425_v1 }
  0xa6   :  { %798 = vmatprep.subr.bf16.mxu0 %v2429_v2  ;;  %839 = vmatprep.subr.bf16.mxu1 %v2431_v3 }
  0xa9   :  { %799 = vmatpush1.bf16.msra.mxu0 %v2435_v4  ;;  %840 = vmatpush1.bf16.msra.mxu1 %v2437_v5 }
  0xaa   :  { %895 = vmatprep.subr.bf16.mxu0 %v2341_v33  ;;  %936 = vmatprep.subr.bf16.mxu1 %v2343_v34 }
 0x13f   :  { %v2486_v15 = vpop.f32.mrb[0].mxu0  ;;  %v2488_v16 = vpop.f32.mrb[0].mxu1 }
 0x140   :  { %v368_v19 = vpop.f32.mrb[1].mxu0  ;;  %v441_v20 = vpop.f32.mrb[1].mxu1 }
 0x141   :  { %v370_v22 = vpop.f32.mrb[2].mxu0  ;;  %v443_v23 = vpop.f32.mrb[2].mxu1 }
 0x142   :  { %v2492_v24 = vadd.f32 %v370_v22, %v131_v18  ;;  %v372_v25 = vpop.f32.mrb[3].mxu0  ;;  %v2495_v26 = vadd.f32 %v443_v23, %v2484_v14  ;;  %v445_v27 = vpop.f32.mrb[3].mxu1 }
 0x143   :  { %v2497_v28 = vadd.f32 %v372_v25, %v135_v21  ;;  %v2500_v29 = vadd.f32 %v445_v27, %v2490_v17 }
 0x147   :  { %v376_v30 = vpop.f32.mrb[4].mxu0  ;;  %v449_v31 = vpop.f32.mrb[4].mxu1 }
 0x148   :  { %v2502_v32 = vadd.f32 %v376_v30, %v131_v18  ;;  %v378_v35 = vpop.f32.mrb[5].mxu0  ;;  %v2505_v44 = vadd.f32 %v449_v31, %v2484_v14  ;;  %v451_v53 = vpop.f32.mrb[5].mxu1 }
 0x149   :  { %v2507_v62 = vadd.f32 %v378_v35, %v135_v21  ;;  %v380_v6 = vpop.f32.mrb[6].mxu0  ;;  %v2510_v7 = vadd.f32 %v451_v53, %v2490_v17  ;;  %v453_v8 = vpop.f32.mrb[6].mxu1 }
 0x14a   :  { %v2512_v9 = vadd.f32 %v380_v6, %v131_v18  ;;  %v382_v10 = vpop.f32.mrb[7].mxu0  ;;  %v2515_v11 = vadd.f32 %v453_v8, %v2484_v14  ;;  %v455_v12 = vpop.f32.mrb[7].mxu1 }
 0x14b   :  { %2882 = vst [vmem:[#allocation17_spill] sm:$0xff] %v2510_v7  ;;  %v2517_v13 = vadd.f32 %v382_v10, %v135_v21  ;;  %v2520_v22 = vadd.f32 %v455_v12, %v2490_v17 }
 0x14c   :  { %2883 = vst [vmem:[#allocation18_spill] sm:$0xff] %v2512_v9  ;;  %2884 = vst [vmem:[#allocation19_spill] sm:$0xff] %v2515_v11 }
 0x14d   :  { %2885 = vst [vmem:[#allocation20_spill] sm:$0xff] %v2517_v13  ;;  %2886 = vst [vmem:[#allocation21_spill] sm:$0xff] %v2520_v22 }
 0x14f   :  { %v386_v23 = vpop.f32.mrb[8].mxu0  ;;  %v459_v25 = vpop.f32.mrb[8].mxu1 }
 0x150   :  { %v2522_v27 = vadd.f32 %v386_v23, %v131_v18  ;;  %v388_v30 = vpop.f32.mrb[9].mxu0  ;;  %v2525_v31 = vadd.f32 %v459_v25, %v2484_v14  ;;  %v461_v35 = vpop.f32.mrb[9].mxu1 }
 0x151   :  { %v2527_v53 = vadd.f32 %v388_v30, %v135_v21  ;;  %v390_v6 = vpop.f32.mrb[10].mxu0  ;;  %v2530_v8 = vadd.f32 %v461_v35, %v2490_v17  ;;  %v463_v10 = vpop.f32.mrb[10].mxu1 }
 0x152   :  { %2887 = vst [vmem:[#allocation22_spill] sm:$0xff] %v2522_v27  ;;  %2888 = vst [vmem:[#allocation23_spill] sm:$0xff] %v2525_v31  ;;  %v2532_v0 = vadd.f32 %v390_v6, %v131_v18  ;;  %v392_v12 = vpop.f32.mrb[11].mxu0  ;;  %v2535_v22 = vadd.f32 %v463_v10, %v2484_v14  ;;  %v465_v23 = vpop.f32.mrb[11].mxu1 }
 0x153   :  { %2889 = vst [vmem:[#allocation24_spill] sm:$0xff] %v2527_v53  ;;  %2890 = vst [vmem:[#allocation25_spill] sm:$0xff] %v2530_v8  ;;  %v2537_v27 = vadd.f32 %v392_v12, %v135_v21  ;;  %v2540_v25 = vadd.f32 %v465_v23, %v2490_v17 }
 0x154   :  { %2891 = vst [vmem:[#allocation26_spill] sm:$0xff] %v2532_v0  ;;  %2892 = vst [vmem:[#allocation27_spill] sm:$0xff] %v2535_v22 }
 0x155   :  { %2893 = vst [vmem:[#allocation28_spill] sm:$0xff] %v2537_v27  ;;  %2894 = vst [vmem:[#allocation29_spill] sm:$0xff] %v2540_v25 }
 0x157   :  { %v396_v31 = vpop.f32.mrb[12].mxu0  ;;  %v469_v30 = vpop.f32.mrb[12].mxu1 }
 0x158   :  { %v2542_v53 = vadd.f32 %v396_v31, %v131_v18  ;;  %v398_v13 = vpop.f32.mrb[13].mxu0  ;;  %v2545_v35 = vadd.f32 %v469_v30, %v2484_v14  ;;  %v471_v6 = vpop.f32.mrb[13].mxu1 }
 0x159   :  { %v2547_v0 = vadd.f32 %v398_v13, %v135_v21  ;;  %v400_v8 = vpop.f32.mrb[14].mxu0  ;;  %v2550_v10 = vadd.f32 %v471_v6, %v2490_v17  ;;  %v473_v12 = vpop.f32.mrb[14].mxu1  ;;  %v367_v13 = vadd.f32 %v2486_v15, %v131_v18  ;;  %v369_v6 = vadd.f32 %v368_v19, %v135_v21 }
 0x15a   :  { %2895 = vst [vmem:[#allocation30_spill] sm:$0xff] %v2542_v53  ;;  %2896 = vst [vmem:[#allocation31_spill] sm:$0xff] %v2545_v35  ;;  %v2552_v27 = vadd.f32 %v400_v8, %v131_v18  ;;  %v402_v23 = vpop.f32.mrb[15].mxu0  ;;  %v2555_v25 = vadd.f32 %v473_v12, %v2484_v14  ;;  %v475_v31 = vpop.f32.mrb[15].mxu1 }
 0x15b   :  { %2897 = vst [vmem:[#allocation32_spill] sm:$0xff] %v2547_v0  ;;  %2898 = vst [vmem:[#allocation33_spill] sm:$0xff] %v2550_v10  ;;  %v2557_v53 = vadd.f32 %v402_v23, %v135_v21  ;;  %v2560_v30 = vadd.f32 %v475_v31, %v2490_v17  ;;  %v440_v0 = vadd.f32 %v2488_v16, %v2484_v14 }
 0x15c   :  { %2899 = vst [vmem:[#allocation34_spill] sm:$0xff] %v2552_v27  ;;  %2900 = vst [vmem:[#allocation35_spill] sm:$0xff] %v2555_v25  ;;  %v442_v10 = vadd.f32 %v441_v20, %v2490_v17 }
 0x15d   :  { %2901 = vst [vmem:[#allocation36_spill] sm:$0xff] %v2557_v53  ;;  %2902 = vst [vmem:[#allocation37_spill] sm:$0xff] %v2560_v30 }
 0x15f   :  { %v707_v8 = vpop.f32.mrb[16].mxu0  ;;  %v748_v27 = vpop.f32.mrb[16].mxu1 }
 0x160   :  { %v755_v35 = vadd.f32 %v707_v8, %v367_v13  ;;  %v757_v22 = vadd.f32 %v748_v27, %v440_v0  ;;  %v709_v12 = vpop.f32.mrb[17].mxu0  ;;  %v750_v25 = vpop.f32.mrb[17].mxu1 }
 0x161   :  { %v756_v11 = vadd.f32 %v709_v12, %v369_v6  ;;  %v758_v23 = vadd.f32 %v750_v25, %v442_v10  ;;  %v711_v53 = vpop.f32.mrb[18].mxu0  ;;  %v752_v9 = vpop.f32.mrb[18].mxu1 }
 0x162   :  { %v1763_v31 = vmul.f32 -1.442695, %v755_v35  ;;  %v712_v30 = vpop.f32.mrb[19].mxu0  ;;  %v753_v7 = vpop.f32.mrb[19].mxu1  ;;  %v1765_v14 = vmul.f32 -1.442695, %v757_v22 }
 0x163   :  { %v1764_v15 = vmul.f32 -1.442695, %v756_v11  ;;  %v2903_v30 = vmov 0  }
 0x164   :  { %1946 = vpow2.f32 %v1763_v31 }
 0x165   :  { %1948 = vpow2.f32 %v1764_v15 }
 0x166   :  { %1950 = vtanh.f32 %v758_v23 }
 0x167   :  { %1952 = vpow2.f32 %v1765_v14 }
 0x16e   :  { %v1947_v16 = vpop.eup %1946 }
 0x16f   :  { %v768_v18 = vadd.f32 1.0, %v1947_v16  ;;  %v1949_v17 = vpop.eup %1948 }
 0x170   :  { %v769_v0 = vadd.f32 1.0, %v1949_v17  ;;  %v1951_v19 = vpop.eup %1950 }
 0x171   :  { %1954 = vrcp.f32 %v768_v18  ;;  %v1953_v20 = vpop.eup %1952 }
 0x172   :  { %1956 = vrcp.f32 %v769_v0  ;;  %v770_v53 = vadd.f32 1.0, %v1953_v20 }
 0x174   :  { %1958 = vrcp.f32 %v770_v53 }
 0x17b   :  { %v1955_v21 = vpop.eup %1954 }
 0x17c   :  { %v779_v27 = vmul.f32 %v1955_v21, %v1951_v19  ;;  %v1957_v9 = vpop.eup %1956 }
 0x17d   :  { %v778_v25 = vmul.f32 0.0, %v1957_v9 }
 0x17e   :  { %v1959_v11 = vpop.eup %1958 }
 0x17f   :  { %v2566_v7 = vadd.f32 %v779_v27, %v778_v25 }
 0x181   :  { %1960 = vtanh.f32 %v2566_v7 }
 0x18b   :  { %v1961_v22 = vpop.eup %1960 }
 0x18c   :  { %v782_v35 = vmul.f32 %v1961_v22, %v1959_v11 }
 0x18e   :  { %v783_v10 = vpack.c.bf16 %v782_v35, %v782_v35 }
 0x190   :  { %817 = vmatmul.mubr.bf16.vlgmr.msra.gmra.mrb[20].mxu0 %v783_v10  ;;  %858 = vmatmul.mubr.bf16.vlgmr.msra.gmra.mrb[20].mxu1 %v783_v10 }
 0x191   :  { %896 = vmatpush1.bf16.msra.mxu0 %v2345_v36  ;;  %937 = vmatpush1.bf16.msra.mxu1 %v2347_v37 }
 0x192   :  { %897 = vmatprep.subr.bf16.mxu0 %v2351_v38  ;;  %938 = vmatprep.subr.bf16.mxu1 %v2353_v39 }
 0x193   :  { %927 = vmatprep.mubr.bf16.mxu0 %v2903_v30  ;;  %968 = vmatprep.mubr.bf16.mxu1 %v2903_v30 }
 0x195   :  { %898 = vmatpush1.bf16.msra.mxu0 %v2355_v40  ;;  %939 = vmatpush1.bf16.msra.mxu1 %v2359_v41 }
 0x196   :  { %899 = vmatprep.subr.bf16.mxu0 %v2363_v42  ;;  %940 = vmatprep.subr.bf16.mxu1 %v2365_v43 }
 0x199   :  { %900 = vmatpush1.bf16.msra.mxu0 %v2369_v45  ;;  %941 = vmatpush1.bf16.msra.mxu1 %v2371_v46 }
 0x19a   :  { %901 = vmatprep.subr.bf16.mxu0 %v2375_v47  ;;  %942 = vmatprep.subr.bf16.mxu1 %v2379_v48 }
 0x19d   :  { %902 = vmatpush1.bf16.msra.mxu0 %v2381_v49  ;;  %943 = vmatpush1.bf16.msra.mxu1 %v2383_v50 }
 0x19e   :  { %903 = vmatprep.subr.bf16.mxu0 %v2387_v51  ;;  %944 = vmatprep.subr.bf16.mxu1 %v2391_v52 }
 0x1a1   :  { %904 = vmatpush1.bf16.msra.mxu0 %v2395_v54  ;;  %945 = vmatpush1.bf16.msra.mxu1 %v2397_v55 }
 0x1a2   :  { %905 = vmatprep.subr.bf16.mxu0 %v2399_v56  ;;  %946 = vmatprep.subr.bf16.mxu1 %v2401_v57 }
 0x1a5   :  { %906 = vmatpush1.bf16.msra.mxu0 %v2409_v58  ;;  %947 = vmatpush1.bf16.msra.mxu1 %v2411_v59 }
 0x1a6   :  { %907 = vmatprep.subr.bf16.mxu0 %v2415_v60  ;;  %948 = vmatprep.subr.bf16.mxu1 %v2417_v61 }
 0x1a9   :  { %908 = vmatpush1.bf16.msra.mxu0 %v2423_v63  ;;  %949 = vmatpush1.bf16.msra.mxu1 %v2425_v1 }
 0x1aa   :  { %909 = vmatprep.subr.bf16.mxu0 %v2429_v2  ;;  %950 = vmatprep.subr.bf16.mxu1 %v2431_v3 }
 0x1ad   :  { %910 = vmatpush1.bf16.msra.mxu0 %v2435_v4  ;;  %951 = vmatpush1.bf16.msra.mxu1 %v2437_v5 }
 0x1ae   :  { %1006 = vmatprep.subr.bf16.mxu0 %v2341_v33  ;;  %1047 = vmatprep.subr.bf16.mxu1 %v2343_v34 }
 0x263   :  { %v818_v13 = vpop.f32.mrb[20].mxu0  ;;  %v859_v6 = vpop.f32.mrb[20].mxu1 }
 0x264   :  { %v866_v8 = vadd.f32 %v818_v13, %v2492_v24  ;;  %v868_v12 = vadd.f32 %v859_v6, %v2495_v26  ;;  %v820_v23 = vpop.f32.mrb[21].mxu0  ;;  %v861_v31 = vpop.f32.mrb[21].mxu1 }
 0x265   :  { %v867_v15 = vadd.f32 %v820_v23, %v2497_v28  ;;  %v869_v14 = vadd.f32 %v861_v31, %v2500_v29  ;;  %v822_v16 = vpop.f32.mrb[22].mxu0  ;;  %v863_v18 = vpop.f32.mrb[22].mxu1 }
 0x266   :  { %v1766_v17 = vmul.f32 -1.442695, %v866_v8  ;;  %v823_v0 = vpop.f32.mrb[23].mxu0  ;;  %v864_v19 = vpop.f32.mrb[23].mxu1  ;;  %v1768_v21 = vmul.f32 -1.442695, %v868_v12 }
 0x267   :  { %v1767_v20 = vmul.f32 -1.442695, %v867_v15 }
 0x268   :  { %1962 = vpow2.f32 %v1766_v17  ;;  %v2904_v17 = vld [vmem:[#allocation17_spill] sm:$0xff] }
 0x269   :  { %1964 = vpow2.f32 %v1767_v20 }
 0x26a   :  { %1966 = vtanh.f32 %v869_v14 }
 0x26b   :  { %1968 = vpow2.f32 %v1768_v21 }
 0x272   :  { %v1963_v27 = vpop.eup %1962 }
 0x273   :  { %v879_v9 = vadd.f32 1.0, %v1963_v27  ;;  %v1965_v24 = vpop.eup %1964 }
 0x274   :  { %v880_v26 = vadd.f32 1.0, %v1965_v24  ;;  %v1967_v28 = vpop.eup %1966 }
 0x275   :  { %1970 = vrcp.f32 %v879_v9  ;;  %v1969_v53 = vpop.eup %1968 }
 0x276   :  { %1972 = vrcp.f32 %v880_v26  ;;  %v881_v22 = vadd.f32 1.0, %v1969_v53 }
 0x278   :  { %1974 = vrcp.f32 %v881_v22 }
 0x27f   :  { %v1971_v29 = vpop.eup %1970 }
 0x280   :  { %v890_v25 = vmul.f32 %v1971_v29, %v1967_v28  ;;  %v1973_v11 = vpop.eup %1972 }
 0x281   :  { %v889_v35 = vmul.f32 %v1973_v11, %v2566_v7 }
 0x282   :  { %v1975_v13 = vpop.eup %1974 }
 0x283   :  { %v2608_v10 = vadd.f32 %v890_v25, %v889_v35 }
 0x285   :  { %1976 = vtanh.f32 %v2608_v10 }
 0x28f   :  { %v1977_v6 = vpop.eup %1976 }
 0x290   :  { %v893_v8 = vmul.f32 %v1977_v6, %v1975_v13 }
 0x292   :  { %v894_v12 = vpack.c.bf16 %v893_v8, %v893_v8 }
 0x294   :  { %928 = vmatmul.mubr.bf16.vlgmr.msra.gmra.mrb[24].mxu0 %v894_v12  ;;  %969 = vmatmul.mubr.bf16.vlgmr.msra.gmra.mrb[24].mxu1 %v894_v12 }
 0x295   :  { %1007 = vmatpush1.bf16.msra.mxu0 %v2345_v36  ;;  %1048 = vmatpush1.bf16.msra.mxu1 %v2347_v37 }
 0x296   :  { %1008 = vmatprep.subr.bf16.mxu0 %v2351_v38  ;;  %1049 = vmatprep.subr.bf16.mxu1 %v2353_v39 }
 0x297   :  { %1038 = vmatprep.mubr.bf16.mxu0 %v2903_v30  ;;  %1079 = vmatprep.mubr.bf16.mxu1 %v2903_v30 }
 0x299   :  { %1009 = vmatpush1.bf16.msra.mxu0 %v2355_v40  ;;  %1050 = vmatpush1.bf16.msra.mxu1 %v2359_v41 }
 0x29a   :  { %1010 = vmatprep.subr.bf16.mxu0 %v2363_v42  ;;  %1051 = vmatprep.subr.bf16.mxu1 %v2365_v43 }
 0x29d   :  { %1011 = vmatpush1.bf16.msra.mxu0 %v2369_v45  ;;  %1052 = vmatpush1.bf16.msra.mxu1 %v2371_v46 }
 0x29e   :  { %1012 = vmatprep.subr.bf16.mxu0 %v2375_v47  ;;  %1053 = vmatprep.subr.bf16.mxu1 %v2379_v48 }
 0x2a1   :  { %1013 = vmatpush1.bf16.msra.mxu0 %v2381_v49  ;;  %1054 = vmatpush1.bf16.msra.mxu1 %v2383_v50 }
 0x2a2   :  { %1014 = vmatprep.subr.bf16.mxu0 %v2387_v51  ;;  %1055 = vmatprep.subr.bf16.mxu1 %v2391_v52 }
 0x2a5   :  { %1015 = vmatpush1.bf16.msra.mxu0 %v2395_v54  ;;  %1056 = vmatpush1.bf16.msra.mxu1 %v2397_v55 }
 0x2a6   :  { %1016 = vmatprep.subr.bf16.mxu0 %v2399_v56  ;;  %1057 = vmatprep.subr.bf16.mxu1 %v2401_v57 }
 0x2a9   :  { %1017 = vmatpush1.bf16.msra.mxu0 %v2409_v58  ;;  %1058 = vmatpush1.bf16.msra.mxu1 %v2411_v59 }
 0x2aa   :  { %1018 = vmatprep.subr.bf16.mxu0 %v2415_v60  ;;  %1059 = vmatprep.subr.bf16.mxu1 %v2417_v61 }
 0x2ad   :  { %1019 = vmatpush1.bf16.msra.mxu0 %v2423_v63  ;;  %1060 = vmatpush1.bf16.msra.mxu1 %v2425_v1 }
 0x2ae   :  { %1020 = vmatprep.subr.bf16.mxu0 %v2429_v2  ;;  %1061 = vmatprep.subr.bf16.mxu1 %v2431_v3 }
 0x2b1   :  { %1021 = vmatpush1.bf16.msra.mxu0 %v2435_v4  ;;  %1062 = vmatpush1.bf16.msra.mxu1 %v2437_v5 }
 0x2b2   :  { %1117 = vmatprep.subr.bf16.mxu0 %v2341_v33  ;;  %1158 = vmatprep.subr.bf16.mxu1 %v2343_v34 }
 0x367   :  { %v929_v7 = vpop.f32.mrb[24].mxu0  ;;  %v970_v23 = vpop.f32.mrb[24].mxu1 }
 0x368   :  { %v977_v31 = vadd.f32 %v929_v7, %v2502_v32  ;;  %v979_v15 = vadd.f32 %v970_v23, %v2505_v44  ;;  %v931_v14 = vpop.f32.mrb[25].mxu0  ;;  %v972_v16 = vpop.f32.mrb[25].mxu1 }
 0x369   :  { %v978_v18 = vadd.f32 %v931_v14, %v2507_v62  ;;  %v980_v0 = vadd.f32 %v972_v16, %v2904_v17  ;;  %v933_v19 = vpop.f32.mrb[26].mxu0  ;;  %v974_v20 = vpop.f32.mrb[26].mxu1  ;;  %v2906_v16 = vld [vmem:[#allocation19_spill] sm:$0xff] }
 0x36a   :  { %v1769_v21 = vmul.f32 -1.442695, %v977_v31  ;;  %v934_v27 = vpop.f32.mrb[27].mxu0  ;;  %v975_v9 = vpop.f32.mrb[27].mxu1  ;;  %v1771_v26 = vmul.f32 -1.442695, %v979_v15 }
 0x36b   :  { %v1770_v24 = vmul.f32 -1.442695, %v978_v18  ;;  %v2905_v15 = vld [vmem:[#allocation18_spill] sm:$0xff]  ;;  %v2907_v19 = vld [vmem:[#allocation20_spill] sm:$0xff] }
 0x36c   :  { %1978 = vpow2.f32 %v1769_v21  ;;  %v2908_v21 = vld [vmem:[#allocation21_spill] sm:$0xff] }
 0x36d   :  { %1980 = vpow2.f32 %v1770_v24 }
 0x36e   :  { %1982 = vtanh.f32 %v980_v0 }
 0x36f   :  { %1984 = vpow2.f32 %v1771_v26 }
 0x376   :  { %v1979_v28 = vpop.eup %1978 }
 0x377   :  { %v990_v53 = vadd.f32 1.0, %v1979_v28  ;;  %v1981_v32 = vpop.eup %1980 }
 0x378   :  { %v991_v44 = vadd.f32 1.0, %v1981_v32  ;;  %v1983_v62 = vpop.eup %1982 }
 0x379   :  { %1986 = vrcp.f32 %v990_v53  ;;  %v1985_v29 = vpop.eup %1984 }
 0x37a   :  { %1988 = vrcp.f32 %v991_v44  ;;  %v992_v35 = vadd.f32 1.0, %v1985_v29 }
 0x37c   :  { %1990 = vrcp.f32 %v992_v35 }
 0x383   :  { %v1987_v25 = vpop.eup %1986 }
 0x384   :  { %v1001_v11 = vmul.f32 %v1987_v25, %v1983_v62  ;;  %v1989_v22 = vpop.eup %1988 }
 0x385   :  { %v1000_v13 = vmul.f32 %v1989_v22, %v2608_v10 }
 0x386   :  { %v1991_v8 = vpop.eup %1990 }
 0x387   :  { %v2650_v6 = vadd.f32 %v1001_v11, %v1000_v13 }
 0x389   :  { %1992 = vtanh.f32 %v2650_v6 }
 0x393   :  { %v1993_v12 = vpop.eup %1992 }
 0x394   :  { %v1004_v7 = vmul.f32 %v1993_v12, %v1991_v8 }
 0x396   :  { %v1005_v23 = vpack.c.bf16 %v1004_v7, %v1004_v7 }
 0x398   :  { %1039 = vmatmul.mubr.bf16.vlgmr.msra.gmra.mrb[28].mxu0 %v1005_v23  ;;  %1080 = vmatmul.mubr.bf16.vlgmr.msra.gmra.mrb[28].mxu1 %v1005_v23 }
 0x399   :  { %1118 = vmatpush1.bf16.msra.mxu0 %v2345_v36  ;;  %1159 = vmatpush1.bf16.msra.mxu1 %v2347_v37 }
 0x39a   :  { %1119 = vmatprep.subr.bf16.mxu0 %v2351_v38  ;;  %1160 = vmatprep.subr.bf16.mxu1 %v2353_v39 }
 0x39b   :  { %1149 = vmatprep.mubr.bf16.mxu0 %v2903_v30  ;;  %1190 = vmatprep.mubr.bf16.mxu1 %v2903_v30 }
 0x39d   :  { %1120 = vmatpush1.bf16.msra.mxu0 %v2355_v40  ;;  %1161 = vmatpush1.bf16.msra.mxu1 %v2359_v41 }
 0x39e   :  { %1121 = vmatprep.subr.bf16.mxu0 %v2363_v42  ;;  %1162 = vmatprep.subr.bf16.mxu1 %v2365_v43 }
 0x3a1   :  { %1122 = vmatpush1.bf16.msra.mxu0 %v2369_v45  ;;  %1163 = vmatpush1.bf16.msra.mxu1 %v2371_v46 }
 0x3a2   :  { %1123 = vmatprep.subr.bf16.mxu0 %v2375_v47  ;;  %1164 = vmatprep.subr.bf16.mxu1 %v2379_v48 }
 0x3a5   :  { %1124 = vmatpush1.bf16.msra.mxu0 %v2381_v49  ;;  %1165 = vmatpush1.bf16.msra.mxu1 %v2383_v50 }
 0x3a6   :  { %1125 = vmatprep.subr.bf16.mxu0 %v2387_v51  ;;  %1166 = vmatprep.subr.bf16.mxu1 %v2391_v52 }
 0x3a9   :  { %1126 = vmatpush1.bf16.msra.mxu0 %v2395_v54  ;;  %1167 = vmatpush1.bf16.msra.mxu1 %v2397_v55 }
 0x3aa   :  { %1127 = vmatprep.subr.bf16.mxu0 %v2399_v56  ;;  %1168 = vmatprep.subr.bf16.mxu1 %v2401_v57 }
 0x3ad   :  { %1128 = vmatpush1.bf16.msra.mxu0 %v2409_v58  ;;  %1169 = vmatpush1.bf16.msra.mxu1 %v2411_v59 }
 0x3ae   :  { %1129 = vmatprep.subr.bf16.mxu0 %v2415_v60  ;;  %1170 = vmatprep.subr.bf16.mxu1 %v2417_v61 }
 0x3b1   :  { %1130 = vmatpush1.bf16.msra.mxu0 %v2423_v63  ;;  %1171 = vmatpush1.bf16.msra.mxu1 %v2425_v1 }
 0x3b2   :  { %1131 = vmatprep.subr.bf16.mxu0 %v2429_v2  ;;  %1172 = vmatprep.subr.bf16.mxu1 %v2431_v3 }
 0x3b5   :  { %1132 = vmatpush1.bf16.msra.mxu0 %v2435_v4  ;;  %1173 = vmatpush1.bf16.msra.mxu1 %v2437_v5 }
 0x3b6   :  { %1228 = vmatprep.subr.bf16.mxu0 %v2341_v33  ;;  %1269 = vmatprep.subr.bf16.mxu1 %v2343_v34 }
 0x46b   :  { %v1040_v10 = vpop.f32.mrb[28].mxu0  ;;  %v1081_v31 = vpop.f32.mrb[28].mxu1 }
 0x46c   :  { %v1088_v14 = vadd.f32 %v1040_v10, %v2905_v15  ;;  %v1090_v18 = vadd.f32 %v1081_v31, %v2906_v16  ;;  %v1042_v17 = vpop.f32.mrb[29].mxu0  ;;  %v1083_v0 = vpop.f32.mrb[29].mxu1 }
 0x46d   :  { %v1089_v20 = vadd.f32 %v1042_v17, %v2907_v19  ;;  %v1091_v27 = vadd.f32 %v1083_v0, %v2908_v21  ;;  %v1044_v9 = vpop.f32.mrb[30].mxu0  ;;  %v1085_v24 = vpop.f32.mrb[30].mxu1 }
 0x46e   :  { %v1772_v26 = vmul.f32 -1.442695, %v1088_v14  ;;  %v1045_v28 = vpop.f32.mrb[31].mxu0  ;;  %v1086_v53 = vpop.f32.mrb[31].mxu1  ;;  %v1774_v34 = vmul.f32 -1.442695, %v1090_v18 }
 0x46f   :  { %v1773_v33 = vmul.f32 -1.442695, %v1089_v20 }
 0x470   :  { %1994 = vpow2.f32 %v1772_v26 }
 0x471   :  { %1996 = vpow2.f32 %v1773_v33 }
 0x472   :  { %1998 = vtanh.f32 %v1091_v27 }
 0x473   :  { %2000 = vpow2.f32 %v1774_v34 }
 0x47a   :  { %v1995_v32 = vpop.eup %1994 }
 0x47b   :  { %v1101_v44 = vadd.f32 1.0, %v1995_v32  ;;  %v1997_v62 = vpop.eup %1996  ;;  %v2741_v32 = vld [vmem:[#allocation9] ss:$16 sps:$4 sm:$0xff]  }
 0x47c   :  { %v1102_v29 = vadd.f32 1.0, %v1997_v62  ;;  %v1999_v25 = vpop.eup %1998  ;;  %v2747_v62 = vld [vmem:[#allocation9 + $0x24] ss:$16 sps:$4 sm:$0xff]  }
 0x47d   :  { %2002 = vrcp.f32 %v1101_v44  ;;  %v2001_v11 = vpop.eup %2000  ;;  %v2744_v44 = vld [vmem:[#allocation9 + $0x8] ss:$16 sps:$4 sm:$0xff]  }
 0x47e   :  { %2004 = vrcp.f32 %v1102_v29  ;;  %v1103_v8 = vadd.f32 1.0, %v2001_v11  ;;  %v2750_v29 = vld [vmem:[#allocation9 + $0x2c] ss:$16 sps:$4 sm:$0xff]   ;;  %v2758_v11 = vld [vmem:[#allocation9 + $0x28] ss:$16 sps:$4 sm:$0xff]  }
 0x480   :  { %2006 = vrcp.f32 %v1103_v8  ;;  %v2770_v8 = vld [vmem:[#allocation9 + $0x48] ss:$16 sps:$4 sm:$0xff]  }
 0x487   :  { %v2003_v22 = vpop.eup %2002 }
 0x488   :  { %v1112_v35 = vmul.f32 %v2003_v22, %v1999_v25  ;;  %v2005_v13 = vpop.eup %2004  ;;  %v2755_v25 = vld [vmem:[#allocation9 + $0x20] ss:$16 sps:$4 sm:$0xff]   ;;  %v2761_v22 = vld [vmem:[#allocation9 + $0x44] ss:$16 sps:$4 sm:$0xff]  }
 0x489   :  { %v1111_v12 = vmul.f32 %v2005_v13, %v2650_v6  ;;  %v2767_v13 = vld [vmem:[#allocation9 + $0x40] ss:$16 sps:$4 sm:$0xff]  }
 0x48a   :  { %v2007_v23 = vpop.eup %2006 }
 0x48b   :  { %v2692_v7 = vadd.f32 %v1112_v35, %v1111_v12  ;;  %v2764_v35 = vld [vmem:[#allocation9 + $0x4c] ss:$16 sps:$4 sm:$0xff]   ;;  %v2773_v12 = vld [vmem:[#allocation9 + $0x64] ss:$16 sps:$4 sm:$0xff]  }
 0x48d   :  { %2008 = vtanh.f32 %v2692_v7 }
 0x497   :  { %v2009_v10 = vpop.eup %2008 }
 0x498   :  { %v1115_v31 = vmul.f32 %v2009_v10, %v2007_v23  ;;  %v2779_v23 = vld [vmem:[#allocation9 + $0x60] ss:$16 sps:$4 sm:$0xff]   ;;  %v2782_v10 = vld [vmem:[#allocation9 + $0x68] ss:$16 sps:$4 sm:$0xff]  }
 0x49a   :  { %v1116_v15 = vpack.c.bf16 %v1115_v31, %v1115_v31  ;;  %v2785_v31 = vld [vmem:[#allocation9 + $0x84] ss:$16 sps:$4 sm:$0xff]  }
 0x49c   :  { %1150 = vmatmul.mubr.bf16.vlgmr.msra.gmra.mrb[32].mxu0 %v1116_v15  ;;  %1191 = vmatmul.mubr.bf16.vlgmr.msra.gmra.mrb[32].mxu1 %v1116_v15  ;;  %v2788_v15 = vld [vmem:[#allocation9 + $0x8c] ss:$16 sps:$4 sm:$0xff]  }
 0x49d   :  { %1229 = vmatpush1.bf16.msra.mxu0 %v2345_v36  ;;  %1270 = vmatpush1.bf16.msra.mxu1 %v2347_v37  ;;  %v2727_v36 = vld [vmem:[#allocation9 + $0x4] ss:$16 sps:$4 sm:$0xff]   ;;  %v2730_v37 = vld [vmem:[#allocation9 + $0xc] ss:$16 sps:$4 sm:$0xff]  }
 0x49e   :  { %1230 = vmatprep.subr.bf16.mxu0 %v2351_v38  ;;  %1271 = vmatprep.subr.bf16.mxu1 %v2353_v39 }
 0x49f   :  { %1260 = vmatprep.mubr.bf16.mxu0 %v2903_v30  ;;  %1301 = vmatprep.mubr.bf16.mxu1 %v2903_v30 }
 0x4a1   :  { %1231 = vmatpush1.bf16.msra.mxu0 %v2355_v40  ;;  %1272 = vmatpush1.bf16.msra.mxu1 %v2359_v41  ;;  %v2909_v40 = vld [vmem:[#allocation22_spill] sm:$0xff] }
 0x4a2   :  { %1232 = vmatprep.subr.bf16.mxu0 %v2363_v42  ;;  %1273 = vmatprep.subr.bf16.mxu1 %v2365_v43  ;;  %v2910_v42 = vld [vmem:[#allocation23_spill] sm:$0xff] }
 0x4a5   :  { %1233 = vmatpush1.bf16.msra.mxu0 %v2369_v45  ;;  %1274 = vmatpush1.bf16.msra.mxu1 %v2371_v46 }
 0x4a6   :  { %1234 = vmatprep.subr.bf16.mxu0 %v2375_v47  ;;  %1275 = vmatprep.subr.bf16.mxu1 %v2379_v48  ;;  %v2911_v47 = vld [vmem:[#allocation24_spill] sm:$0xff] }
 0x4a9   :  { %1235 = vmatpush1.bf16.msra.mxu0 %v2381_v49  ;;  %1276 = vmatpush1.bf16.msra.mxu1 %v2383_v50  ;;  %v2912_v49 = vld [vmem:[#allocation25_spill] sm:$0xff] }
 0x4aa   :  { %1236 = vmatprep.subr.bf16.mxu0 %v2387_v51  ;;  %1277 = vmatprep.subr.bf16.mxu1 %v2391_v52 }
 0x4ad   :  { %1237 = vmatpush1.bf16.msra.mxu0 %v2395_v54  ;;  %1278 = vmatpush1.bf16.msra.mxu1 %v2397_v55 }
 0x4ae   :  { %1238 = vmatprep.subr.bf16.mxu0 %v2399_v56  ;;  %1279 = vmatprep.subr.bf16.mxu1 %v2401_v57 }
 0x4b1   :  { %1239 = vmatpush1.bf16.msra.mxu0 %v2409_v58  ;;  %1280 = vmatpush1.bf16.msra.mxu1 %v2411_v59 }
 0x4b2   :  { %1240 = vmatprep.subr.bf16.mxu0 %v2415_v60  ;;  %1281 = vmatprep.subr.bf16.mxu1 %v2417_v61 }
 0x4b5   :  { %1241 = vmatpush1.bf16.msra.mxu0 %v2423_v63  ;;  %1282 = vmatpush1.bf16.msra.mxu1 %v2425_v1 }
 0x4b6   :  { %1242 = vmatprep.subr.bf16.mxu0 %v2429_v2  ;;  %1283 = vmatprep.subr.bf16.mxu1 %v2431_v3 }
 0x4b9   :  { %1243 = vmatpush1.bf16.msra.mxu0 %v2435_v4  ;;  %1284 = vmatpush1.bf16.msra.mxu1 %v2437_v5 }
 0x4ba   :  { %1339 = vmatprep.subr.bf16.mxu0 %v2727_v36  ;;  %1380 = vmatprep.subr.bf16.mxu1 %v2730_v37 }
 0x56f   :  { %v1151_v38 = vpop.f32.mrb[32].mxu0  ;;  %v1192_v39 = vpop.f32.mrb[32].mxu1 }
 0x570   :  { %v1199_v41 = vadd.f32 %v1151_v38, %v2909_v40  ;;  %v1201_v43 = vadd.f32 %v1192_v39, %v2910_v42  ;;  %v1153_v45 = vpop.f32.mrb[33].mxu0  ;;  %v1194_v46 = vpop.f32.mrb[33].mxu1  ;;  %v2791_v38 = vld [vmem:[#allocation9 + $0x80] ss:$16 sps:$4 sm:$0xff]   ;;  %v2794_v39 = vld [vmem:[#allocation9 + $0x88] ss:$16 sps:$4 sm:$0xff]  }
 0x571   :  { %v1200_v48 = vadd.f32 %v1153_v45, %v2911_v47  ;;  %v1202_v50 = vadd.f32 %v1194_v46, %v2912_v49  ;;  %v1155_v51 = vpop.f32.mrb[34].mxu0  ;;  %v1196_v52 = vpop.f32.mrb[34].mxu1  ;;  %v2797_v40 = vld [vmem:[#allocation9 + $0xa4] ss:$16 sps:$4 sm:$0xff]   ;;  %v2914_v42 = vld [vmem:[#allocation27_spill] sm:$0xff]  ;;  %v2916_v46 = vld [vmem:[#allocation29_spill] sm:$0xff] }
 0x572   :  { %v1775_v54 = vmul.f32 -1.442695, %v1199_v41  ;;  %v1156_v55 = vpop.f32.mrb[35].mxu0  ;;  %v1197_v56 = vpop.f32.mrb[35].mxu1  ;;  %v1777_v6 = vmul.f32 -1.442695, %v1201_v43 }
 0x573   :  { %v1776_v57 = vmul.f32 -1.442695, %v1200_v48  ;;  %v2800_v41 = vld [vmem:[#allocation9 + $0xac] ss:$16 sps:$4 sm:$0xff]   ;;  %v2915_v45 = vld [vmem:[#allocation28_spill] sm:$0xff] }
 0x574   :  { %2010 = vpow2.f32 %v1775_v54 }
 0x575   :  { %2012 = vpow2.f32 %v1776_v57 }
 0x576   :  { %2014 = vtanh.f32 %v1202_v50 }
 0x577   :  { %2016 = vpow2.f32 %v1777_v6 }
 0x57e   :  { %v2011_v14 = vpop.eup %2010 }
 0x57f   :  { %v1212_v16 = vadd.f32 1.0, %v2011_v14  ;;  %v2013_v18 = vpop.eup %2012 }
 0x580   :  { %v1213_v17 = vadd.f32 1.0, %v2013_v18  ;;  %v2015_v0 = vpop.eup %2014 }
 0x581   :  { %2018 = vrcp.f32 %v1212_v16  ;;  %v2017_v19 = vpop.eup %2016 }
 0x582   :  { %2020 = vrcp.f32 %v1213_v17  ;;  %v1214_v9 = vadd.f32 1.0, %v2017_v19 }
 0x584   :  { %2022 = vrcp.f32 %v1214_v9  ;;  %v2098_v9 = vld [vmem:[#allocation9 + $0xc4] ss:$16 sps:$4 sm:$0xff]  }
 0x58b   :  { %v2019_v20 = vpop.eup %2018 }
 0x58c   :  { %v1223_v21 = vmul.f32 %v2019_v20, %v2015_v0  ;;  %v2021_v27 = vpop.eup %2020 }
 0x58d   :  { %v1222_v24 = vmul.f32 %v2021_v27, %v2692_v7  ;;  %v2776_v7 = vld [vmem:[#allocation9 + $0x6c] ss:$16 sps:$4 sm:$0xff]   ;;  %v2097_v27 = vld [vmem:[#allocation9 + $0xa8] ss:$16 sps:$4 sm:$0xff]  }
 0x58e   :  { %v2023_v28 = vpop.eup %2022 }
 0x58f   :  { %v2738_v26 = vadd.f32 %v1223_v21, %v1222_v24  ;;  %v2099_v24 = vld [vmem:[#allocation9 + $0xcc] ss:$16 sps:$4 sm:$0xff]  }
 0x591   :  { %2024 = vtanh.f32 %v2738_v26 }
 0x59b   :  { %v2025_v53 = vpop.eup %2024 }
 0x59c   :  { %v1226_v33 = vmul.f32 %v2025_v53, %v2023_v28  ;;  %v2101_v28 = vld [vmem:[#allocation9 + $0xc8] ss:$16 sps:$4 sm:$0xff]   ;;  %v2102_v53 = vld [vmem:[#allocation9 + $0xe4] ss:$16 sps:$4 sm:$0xff]  }
 0x59e   :  { %v1227_v34 = vpack.c.bf16 %v1226_v33, %v1226_v33  ;;  %v2103_v33 = vld [vmem:[#allocation9 + $0xec] ss:$16 sps:$4 sm:$0xff]  }
 0x5a0   :  { %1261 = vmatmul.mubr.bf16.vlgmr.msra.gmra.mrb[36].mxu0 %v1227_v34  ;;  %1302 = vmatmul.mubr.bf16.vlgmr.msra.gmra.mrb[36].mxu1 %v1227_v34  ;;  %v2104_v34 = vld [vmem:[#allocation9 + $0xe0] ss:$16 sps:$4 sm:$0xff]  }
 0x5a1   :  { %1340 = vmatpush1.bf16.msra.mxu0 %v2741_v32  ;;  %1381 = vmatpush1.bf16.msra.mxu1 %v2744_v44 }
 0x5a2   :  { %1341 = vmatprep.subr.bf16.mxu0 %v2747_v62  ;;  %1382 = vmatprep.subr.bf16.mxu1 %v2750_v29 }
 0x5a3   :  { %1371 = vmatprep.mubr.bf16.mxu0 %v2903_v30  ;;  %1412 = vmatprep.mubr.bf16.mxu1 %v2903_v30 }
 0x5a5   :  { %1342 = vmatpush1.bf16.msra.mxu0 %v2755_v25  ;;  %1383 = vmatpush1.bf16.msra.mxu1 %v2758_v11 }
 0x5a6   :  { %1343 = vmatprep.subr.bf16.mxu0 %v2761_v22  ;;  %1384 = vmatprep.subr.bf16.mxu1 %v2764_v35 }
 0x5a9   :  { %1344 = vmatpush1.bf16.msra.mxu0 %v2767_v13  ;;  %1385 = vmatpush1.bf16.msra.mxu1 %v2770_v8 }
 0x5aa   :  { %1345 = vmatprep.subr.bf16.mxu0 %v2773_v12  ;;  %1386 = vmatprep.subr.bf16.mxu1 %v2776_v7 }
 0x5ad   :  { %1346 = vmatpush1.bf16.msra.mxu0 %v2779_v23  ;;  %1387 = vmatpush1.bf16.msra.mxu1 %v2782_v10 }
 0x5ae   :  { %1347 = vmatprep.subr.bf16.mxu0 %v2785_v31  ;;  %1388 = vmatprep.subr.bf16.mxu1 %v2788_v15 }
 0x5b1   :  { %1348 = vmatpush1.bf16.msra.mxu0 %v2791_v38  ;;  %1389 = vmatpush1.bf16.msra.mxu1 %v2794_v39 }
 0x5b2   :  { %1349 = vmatprep.subr.bf16.mxu0 %v2797_v40  ;;  %1390 = vmatprep.subr.bf16.mxu1 %v2800_v41 }
 0x5b5   :  { %1350 = vmatpush1.bf16.msra.mxu0 %v2409_v58  ;;  %1391 = vmatpush1.bf16.msra.mxu1 %v2411_v59 }
 0x5b6   :  { %1351 = vmatprep.subr.bf16.mxu0 %v2415_v60  ;;  %1392 = vmatprep.subr.bf16.mxu1 %v2417_v61  ;;  %v2913_v60 = vld [vmem:[#allocation26_spill] sm:$0xff] }
 0x5b9   :  { %1352 = vmatpush1.bf16.msra.mxu0 %v2423_v63  ;;  %1393 = vmatpush1.bf16.msra.mxu1 %v2425_v1 }
 0x5ba   :  { %1353 = vmatprep.subr.bf16.mxu0 %v2429_v2  ;;  %1394 = vmatprep.subr.bf16.mxu1 %v2431_v3 }
 0x5bd   :  { %1354 = vmatpush1.bf16.msra.mxu0 %v2435_v4  ;;  %1395 = vmatpush1.bf16.msra.mxu1 %v2437_v5 }
 0x5be   :  { %1450 = vmatprep.subr.bf16.mxu0 %v2727_v36  ;;  %1491 = vmatprep.subr.bf16.mxu1 %v2730_v37 }
 0x673   :  { %v1262_v58 = vpop.f32.mrb[36].mxu0  ;;  %v1303_v59 = vpop.f32.mrb[36].mxu1 }
 0x674   :  { %v1310_v61 = vadd.f32 %v1262_v58, %v2913_v60  ;;  %v1312_v63 = vadd.f32 %v1303_v59, %v2914_v42  ;;  %v1264_v43 = vpop.f32.mrb[37].mxu0  ;;  %v1305_v1 = vpop.f32.mrb[37].mxu1 }
 0x675   :  { %v1311_v2 = vadd.f32 %v1264_v43, %v2915_v45  ;;  %v1313_v3 = vadd.f32 %v1305_v1, %v2916_v46  ;;  %v1266_v47 = vpop.f32.mrb[38].mxu0  ;;  %v1307_v4 = vpop.f32.mrb[38].mxu1 }
 0x676   :  { %v1778_v48 = vmul.f32 -1.442695, %v1310_v61  ;;  %v1267_v5 = vpop.f32.mrb[39].mxu0  ;;  %v1308_v49 = vpop.f32.mrb[39].mxu1  ;;  %v1780_v37 = vmul.f32 -1.442695, %v1312_v63 }
 0x677   :  { %v1779_v36 = vmul.f32 -1.442695, %v1311_v2  ;;  %v1938_v49 = vld [vmem:[#allocation10] sm:$0xff]  }
 0x678   :  { %2026 = vpow2.f32 %v1778_v48 }
 0x679   :  { %2028 = vpow2.f32 %v1779_v36  ;;  %v2234_v36 = vmov 0.0  }
 0x67a   :  { %2030 = vtanh.f32 %v1313_v3 }
 0x67b   :  { %2032 = vpow2.f32 %v1780_v37  ;;  %v1939_v37 = vld [vmem:[#allocation10 + $0x8] sm:$0xff]  }
 0x682   :  { %v2027_v50 = vpop.eup %2026 }
 0x683   :  { %v1323_v51 = vadd.f32 1.0, %v2027_v50  ;;  %v2029_v52 = vpop.eup %2028  ;;  %v1940_v50 = vld [vmem:[#allocation10 + $0x10] sm:$0xff]  }
 0x684   :  { %v1324_v54 = vadd.f32 1.0, %v2029_v52  ;;  %v2031_v55 = vpop.eup %2030  ;;  %v1942_v52 = vld [vmem:[#allocation10 + $0x20] sm:$0xff]  }
 0x685   :  { %2034 = vrcp.f32 %v1323_v51  ;;  %v2033_v56 = vpop.eup %2032  ;;  %v1941_v51 = vld [vmem:[#allocation10 + $0x18] sm:$0xff]  }
 0x686   :  { %2036 = vrcp.f32 %v1324_v54  ;;  %v1325_v16 = vadd.f32 1.0, %v2033_v56  ;;  %v1943_v54 = vld [vmem:[#allocation10 + $0x28] sm:$0xff]   ;;  %v1945_v56 = vld [vmem:[#allocation10 + $0x38] sm:$0xff]  }
 0x688   :  { %2038 = vrcp.f32 %v1325_v16 }
 0x68f   :  { %v2035_v57 = vpop.eup %2034 }
 0x690   :  { %v1334_v6 = vmul.f32 %v2035_v57, %v2031_v55  ;;  %v2037_v14 = vpop.eup %2036  ;;  %v1944_v55 = vld [vmem:[#allocation10 + $0x30] sm:$0xff]  }
 0x691   :  { %v1333_v18 = vmul.f32 %v2037_v14, %v2738_v26  ;;  %v2100_v26 = vld [vmem:[#allocation9 + $0xc0] ss:$16 sps:$4 sm:$0xff]  }
 0x692   :  { %v2039_v0 = vpop.eup %2038  ;;  %v2921_v14 = vld [vmem:[#allocation34_spill] sm:$0xff] }
 0x693   :  { %v2820_v17 = vadd.f32 %v1334_v6, %v1333_v18  ;;  %v2922_v18 = vld [vmem:[#allocation35_spill] sm:$0xff] }
 0x695   :  { %2040 = vtanh.f32 %v2820_v17 }
 0x69f   :  { %v2041_v19 = vpop.eup %2040 }
 0x6a0   :  { %v1337_v20 = vmul.f32 %v2041_v19, %v2039_v0 }
 0x6a2   :  { %v1338_v21 = vpack.c.bf16 %v1337_v20, %v1337_v20  ;;  %v2923_v20 = vld [vmem:[#allocation36_spill] sm:$0xff] }
 0x6a4   :  { %1372 = vmatmul.mubr.bf16.vlgmr.msra.gmra.mrb[40].mxu0 %v1338_v21  ;;  %1413 = vmatmul.mubr.bf16.vlgmr.msra.gmra.mrb[40].mxu1 %v1338_v21 }
 0x6a5   :  { %1451 = vmatpush1.bf16.msra.mxu0 %v2741_v32  ;;  %1492 = vmatpush1.bf16.msra.mxu1 %v2744_v44  ;;  %v2105_v32 = vld [vmem:[#allocation9 + $0xe8] ss:$16 sps:$4 sm:$0xff]  }
 0x6a6   :  { %1452 = vmatprep.subr.bf16.mxu0 %v2747_v62  ;;  %1493 = vmatprep.subr.bf16.mxu1 %v2750_v29  ;;  %v2917_v29 = vld [vmem:[#allocation30_spill] sm:$0xff] }
 0x6a7   :  { %1482 = vmatprep.mubr.bf16.mxu0 %v2903_v30  ;;  %1523 = vmatprep.mubr.bf16.mxu1 %v2903_v30  ;;  %v2096_v30 = vld [vmem:[#allocation9 + $0xa0] ss:$16 sps:$4 sm:$0xff]  }
 0x6a9   :  { %1453 = vmatpush1.bf16.msra.mxu0 %v2755_v25  ;;  %1494 = vmatpush1.bf16.msra.mxu1 %v2758_v11  ;;  %v2918_v11 = vld [vmem:[#allocation31_spill] sm:$0xff] }
 0x6aa   :  { %1454 = vmatprep.subr.bf16.mxu0 %v2761_v22  ;;  %1495 = vmatprep.subr.bf16.mxu1 %v2764_v35 }
 0x6ad   :  { %1455 = vmatpush1.bf16.msra.mxu0 %v2767_v13  ;;  %1496 = vmatpush1.bf16.msra.mxu1 %v2770_v8  ;;  %v2919_v8 = vld [vmem:[#allocation32_spill] sm:$0xff] }
 0x6ae   :  { %1456 = vmatprep.subr.bf16.mxu0 %v2773_v12  ;;  %1497 = vmatprep.subr.bf16.mxu1 %v2776_v7  ;;  %v2920_v7 = vld [vmem:[#allocation33_spill] sm:$0xff] }
 0x6b1   :  { %1457 = vmatpush1.bf16.msra.mxu0 %v2779_v23  ;;  %1498 = vmatpush1.bf16.msra.mxu1 %v2782_v10 }
 0x6b2   :  { %1458 = vmatprep.subr.bf16.mxu0 %v2785_v31  ;;  %1499 = vmatprep.subr.bf16.mxu1 %v2788_v15 }
 0x6b5   :  { %1459 = vmatpush1.bf16.msra.mxu0 %v2791_v38  ;;  %1500 = vmatpush1.bf16.msra.mxu1 %v2794_v39 }
 0x6b6   :  { %1460 = vmatprep.subr.bf16.mxu0 %v2797_v40  ;;  %1501 = vmatprep.subr.bf16.mxu1 %v2800_v41 }
 0x6b9   :  { %1461 = vmatpush1.bf16.msra.mxu0 %v2096_v30  ;;  %1502 = vmatpush1.bf16.msra.mxu1 %v2097_v27  ;;  %v2924_v30 = vld [vmem:[#allocation37_spill] sm:$0xff] }
 0x6ba   :  { %1462 = vmatprep.subr.bf16.mxu0 %v2098_v9  ;;  %1503 = vmatprep.subr.bf16.mxu1 %v2099_v24 }
 0x6bd   :  { %1463 = vmatpush1.bf16.msra.mxu0 %v2100_v26  ;;  %1504 = vmatpush1.bf16.msra.mxu1 %v2101_v28 }
 0x6be   :  { %1464 = vmatprep.subr.bf16.mxu0 %v2102_v53  ;;  %1505 = vmatprep.subr.bf16.mxu1 %v2103_v33 }
 0x6c1   :  { %1465 = vmatpush1.bf16.msra.mxu0 %v2104_v34  ;;  %1506 = vmatpush1.bf16.msra.mxu1 %v2105_v32 }
 0x6c2   :  { %1805 = vmatprep.subr.bf16.mxu0 %v2234_v36 }
 0x777   :  { %v1373_v44 = vpop.f32.mrb[40].mxu0  ;;  %v1414_v62 = vpop.f32.mrb[40].mxu1 }
 0x778   :  { %v1421_v25 = vadd.f32 %v1373_v44, %v2917_v29  ;;  %v1423_v22 = vadd.f32 %v1414_v62, %v2918_v11  ;;  %v1375_v35 = vpop.f32.mrb[41].mxu0  ;;  %v1416_v13 = vpop.f32.mrb[41].mxu1 }
 0x779   :  { %v1422_v12 = vadd.f32 %v1375_v35, %v2919_v8  ;;  %v1424_v23 = vadd.f32 %v1416_v13, %v2920_v7  ;;  %v1377_v10 = vpop.f32.mrb[42].mxu0  ;;  %v1418_v31 = vpop.f32.mrb[42].mxu1 }
 0x77a   :  { %v1781_v15 = vmul.f32 -1.442695, %v1421_v25  ;;  %v1378_v38 = vpop.f32.mrb[43].mxu0  ;;  %v1419_v39 = vpop.f32.mrb[43].mxu1  ;;  %v1783_v41 = vmul.f32 -1.442695, %v1423_v22 }
 0x77b   :  { %v1782_v40 = vmul.f32 -1.442695, %v1422_v12  ;;  %v1787_v38 = vld [vmem:[%s2878_s5] ss:$0 sm:$0xff] }
 0x77c   :  { %2042 = vpow2.f32 %v1781_v15 }
 0x77d   :  { %2044 = vpow2.f32 %v1782_v40 }
 0x77e   :  { %2046 = vtanh.f32 %v1424_v23 }
 0x77f   :  { %2048 = vpow2.f32 %v1783_v41 }
 0x786   :  { %v2043_v58 = vpop.eup %2042 }
 0x787   :  { %v1434_v59 = vadd.f32 1.0, %v2043_v58  ;;  %v2045_v60 = vpop.eup %2044 }
 0x788   :  { %v1435_v61 = vadd.f32 1.0, %v2045_v60  ;;  %v2047_v42 = vpop.eup %2046 }
 0x789   :  { %2050 = vrcp.f32 %v1434_v59  ;;  %v2049_v63 = vpop.eup %2048 }
 0x78a   :  { %2052 = vrcp.f32 %v1435_v61  ;;  %v1436_v2 = vadd.f32 1.0, %v2049_v63 }
 0x78c   :  { %2054 = vrcp.f32 %v1436_v2 }
 0x793   :  { %v2051_v43 = vpop.eup %2050 }
 0x794   :  { %v1445_v1 = vmul.f32 %v2051_v43, %v2047_v42  ;;  %v2053_v45 = vpop.eup %2052 }
 0x795   :  { %v1444_v46 = vmul.f32 %v2053_v45, %v2820_v17 }
 0x796   :  { %v2055_v47 = vpop.eup %2054 }
 0x797   :  { %v2850_v3 = vadd.f32 %v1445_v1, %v1444_v46 }
 0x799   :  { %2056 = vtanh.f32 %v2850_v3 }
 0x7a3   :  { %v2057_v4 = vpop.eup %2056 }
 0x7a4   :  { %v1448_v48 = vmul.f32 %v2057_v4, %v2055_v47 }
 0x7a6   :  { %v1449_v5 = vpack.c.bf16 %v1448_v48, %v1448_v48 }
 0x7a8   :  { %1483 = vmatmul.mubr.bf16.vlgmr.msra.gmra.mrb[44].mxu0 %v1449_v5  ;;  %1524 = vmatmul.mubr.bf16.vlgmr.msra.gmra.mrb[44].mxu1 %v1449_v5 }
 0x7a9   :  { %1806 = vmatpush3.bf16.msra.mxu0 %v1938_v49  ;;  %1821 = vmatprep.mubr.msk.bf16.mxu0 %vm2235_vm0, %v2234_v36 }
 0x7aa   :  { %1807 = vmatprep.subr.bf16.mxu0 %v2234_v36 }
 0x7ad   :  { %1808 = vmatpush3.bf16.msra.mxu0 %v1939_v37 }
 0x7ae   :  { %1809 = vmatprep.subr.bf16.mxu0 %v2234_v36 }
 0x7b1   :  { %1810 = vmatpush3.bf16.msra.mxu0 %v1940_v50 }
 0x7b2   :  { %1811 = vmatprep.subr.bf16.mxu0 %v2234_v36 }
 0x7b5   :  { %1812 = vmatpush3.bf16.msra.mxu0 %v1941_v51 }
 0x7b6   :  { %1813 = vmatprep.subr.bf16.mxu0 %v2234_v36 }
 0x7b9   :  { %1814 = vmatpush3.bf16.msra.mxu0 %v1942_v52 }
 0x7ba   :  { %1815 = vmatprep.subr.bf16.mxu0 %v2234_v36 }
 0x7bd   :  { %1816 = vmatpush3.bf16.msra.mxu0 %v1943_v54 }
 0x7be   :  { %1817 = vmatprep.subr.bf16.mxu0 %v2234_v36 }
 0x7c1   :  { %1818 = vmatpush3.bf16.msra.mxu0 %v1944_v55 }
 0x7c2   :  { %1819 = vmatprep.subr.bf16.mxu0 %v2234_v36 }
 0x7c5   :  { %1820 = vmatpush3.bf16.msra.mxu0 %v1945_v56 }
 0x87b   :  { %v1484_v57 = vpop.f32.mrb[44].mxu0  ;;  %v1525_v6 = vpop.f32.mrb[44].mxu1 }
 0x87c   :  { %v1532_v16 = vadd.f32 %v1484_v57, %v2921_v14  ;;  %v1534_v17 = vadd.f32 %v1525_v6, %v2922_v18  ;;  %v1486_v0 = vpop.f32.mrb[45].mxu0  ;;  %v1527_v19 = vpop.f32.mrb[45].mxu1 }
 0x87d   :  { %v1533_v21 = vadd.f32 %v1486_v0, %v2923_v20  ;;  %v1535_v27 = vadd.f32 %v1527_v19, %v2924_v30  ;;  %v1488_v9 = vpop.f32.mrb[46].mxu0  ;;  %v1529_v24 = vpop.f32.mrb[46].mxu1 }
 0x87e   :  { %v1784_v26 = vmul.f32 -1.442695, %v1532_v16  ;;  %v1489_v28 = vpop.f32.mrb[47].mxu0  ;;  %v1530_v53 = vpop.f32.mrb[47].mxu1  ;;  %v1786_v34 = vmul.f32 -1.442695, %v1534_v17 }
 0x87f   :  { %v1785_v33 = vmul.f32 -1.442695, %v1533_v21 }
 0x880   :  { %2058 = vpow2.f32 %v1784_v26 }
 0x881   :  { %2060 = vpow2.f32 %v1785_v33 }
 0x882   :  { %2062 = vtanh.f32 %v1535_v27 }
 0x883   :  { %2064 = vpow2.f32 %v1786_v34 }
 0x88a   :  { %v2059_v32 = vpop.eup %2058 }
 0x88b   :  { %v1545_v44 = vadd.f32 1.0, %v2059_v32  ;;  %v2061_v62 = vpop.eup %2060 }
 0x88c   :  { %v1546_v29 = vadd.f32 1.0, %v2061_v62  ;;  %v2063_v25 = vpop.eup %2062 }
 0x88d   :  { %2066 = vrcp.f32 %v1545_v44  ;;  %v2065_v11 = vpop.eup %2064 }
 0x88e   :  { %2068 = vrcp.f32 %v1546_v29  ;;  %v1547_v8 = vadd.f32 1.0, %v2065_v11 }
 0x890   :  { %2070 = vrcp.f32 %v1547_v8 }
 0x897   :  { %v2067_v22 = vpop.eup %2066 }
 0x898   :  { %v1556_v35 = vmul.f32 %v2067_v22, %v2063_v25  ;;  %v2069_v13 = vpop.eup %2068 }
 0x899   :  { %v1555_v12 = vmul.f32 %v2069_v13, %v2850_v3 }
 0x89a   :  { %v2071_v23 = vpop.eup %2070 }
 0x89b   :  { %v1557_v7 = vadd.f32 %v1556_v35, %v1555_v12 }
 0x89d   :  { %2072 = vtanh.f32 %v1557_v7 }
 0x8a7   :  { %v2073_v10 = vpop.eup %2072 }
 0x8a8   :  { %v1559_v31 = vmul.f32 %v2073_v10, %v2071_v23 }
 0x8aa   :  { %v1565_v15 = vpack.c.bf16 %v1559_v31, %v1559_v31 }
 0x8ac   :  { %1822 = vmatmul.mubr.bf16.vlgmr.msra.gmra.mrb[48].mxu0 %v1565_v15 }
 0x97f   :  { %v1671_v39 = vpop.f32.mrb[48].mxu0 }
 0x980   :  { %v1672_v40 = vadd.f32 %v1787_v38, %v1671_v39  ;;  %v1823_v41 = vpop.f32.mrb[49].mxu0 }
 0x981   :  { %v1674_v58 = vpop.f32.mrb[50].mxu0 }
 0x982   :  { %1677 = vst [vmem:[#allocation12] sm:$0xff] %v1672_v40  ;;  %v1824_v59 = vpop.f32.mrb[51].mxu0 }
 0x983   :  { %2205 = shalt.err (!%p2202_p8)
}
 0x984   :  { %s2206_s5 = scalar_lea.hbm %s2879_s6, 128 }
 0x985   :  { %p2207_p9 = scmp.ne.s32.totalorder %s2879_s6, %s2206_s5  ;;  %p2210_p10 = scmp.lt.u32.totalorder %s2206_s5, %s2879_s6 }
 0x987   :  { %p2212_p11 = pnand %p2210_p10, %p2207_p9 }
 0x989   :  { %2215 = shalt.err (!%p2212_p11)
}
 0x98a   :  { %1687 = dma.vmem_to_hbm [thread:$0]  %s1685_s24, 128, %s2879_s6, [#allocation6]  }
 0x98b   :  { %2222 = dma.done.wait [#allocation6], 128  }
 0x98c   :  { %2223 = vsyncadd [#allocation6], 4294967168 }
 0x98d   :  { %1691 = vsyncpa [#allocation5], 1 }
 0x98e   :  { %1692 = vsyncpa [#allocation8], 1 }
 0x98f   :  { %1693 = vsyncpa [#allocation11], 1 }
 0x990   :  { %1694 = vsyncpa [#allocation6], 1 }

</bundles_post_ra>
